<compile_context>
chip_gen: v7x
topology: tpu7x:2x2x1
jax: 0.10.0
libtpu: 0.0.40
codegen_flags: <defaults>
</compile_context>

<pallas_src>
import jax
import jax.numpy as jnp
from jax.experimental import pallas as pl
from jax.experimental.pallas import tpu as pltpu

# Matmul operand dtype.  bfloat16 halves operand bytes and runs the MXU at its
# native rate on v5e/v6e/v7x; accumulation stays float32 via
# preferred_element_type.  Use jnp.float32 for closer PyTorch-f32 parity.
MATMUL_DTYPE = jnp.bfloat16


# ----------------------------------------------------------------------------
# Pallas kernel: conv1+pool -> conv2+pool -> fc1 -> fc2 -> fc3 for one batch tile
# ----------------------------------------------------------------------------
def _convnet_kernel(x_ref, t1_ref, b1c_ref, t2_ref, b2c_ref,
                    w1_ref, bf1_ref, w2_ref, bf2_ref, w3_ref, bf3_ref,
                    out_ref, p1_scr, p2_scr):
    """Fused LeNet forward for one batch tile (all activations stay in VMEM).

    x_ref   (1, TB, 4, 8, 96)  input rows, phase split: [n, h%4, h//4, w*3+c]
    t1_ref  (5, 2, 96, 84)     conv1 row-Toeplitz [kh, w-parity, w*3+c, owp*6+oc]
    b1c_ref (1, 84)            conv1 bias tiled over owp
    t2_ref  (5, 2, 84, 80)     conv2 row-Toeplitz [kh, w-parity, w*6+c, owp*16+oc]
    b2c_ref (1, 80)            conv2 bias tiled over owp
    w1_ref  (5, 80, 128)       fc1 weights, rows permuted to (h, w*16+c), 120->128 col pad
    bf1/2/3 (1, 128)           fc biases (zero padded)
    w2_ref/w3_ref (128, 128)   fc2/fc3 weights (zero padded)
    out_ref (1, TB, 128)       logits (first 10 lanes real)
    p1_scr  (TB, 16, 84) f32   pool1 acts: rows 0-6 even out-rows, 7-13 odd, 14-15 zero
    p2_scr  (TB, 5, 80)  f32   pool2 acts: [n, h, w*16+c]
    """
    f32 = jnp.float32
    TB = x_ref.shape[1]

    # ---------------- conv1 (5x5, 3->6) + bias + ReLU + 2x2 maxpool ----------------
    # Width direction: one Toeplitz matmul per (kernel row i, pool parity p) maps an
    # input row directly onto the 14 even/odd conv outputs of that row.
    # Height direction: rows are phase split (h = 4q + r), so conv-row sums and the
    # 2x2 pool reduce to unit-stride sublane slices and elementwise maxes.
    x2d = x_ref[0].reshape(TB * 32, 96)                       # rows: n*32 + phi*8 + q
    s1 = [[None] * 4 for _ in range(2)]                       # s1[p][r]: conv rows 4s+r
    for p in range(2):
        for i in range(5):
            y = jnp.dot(x2d, t1_ref[i, p], preferred_element_type=f32)
            y = y.reshape(TB, 4, 8, 84)                       # [n, phi, q, owp*6+oc]
            for r in range(4):
                phi, a = (r + i) % 4, (r + i) // 4
                term = y[:, phi, a:a + 7, :]                  # conv rows 4s+r, s=0..6
                s1[p][r] = term if s1[p][r] is None else s1[p][r] + term
    wm1 = [jnp.maximum(s1[0][r], s1[1][r]) for r in range(4)]     # max over pool width
    for e in range(2):                                            # max over pool height
        pooled = jnp.maximum(
            jnp.maximum(wm1[2 * e], wm1[2 * e + 1]) + b1c_ref[...], 0.0)
        p1_scr[:, 7 * e:7 * e + 7, :] = pooled                    # (TB, 7, 84)
    p1_scr[:, 14:16, :] = jnp.zeros((TB, 2, 84), f32)             # pad rows (never read)

    # ---------------- conv2 (5x5, 6->16) + bias + ReLU + 2x2 maxpool ----------------
    h1 = p1_scr[...].astype(t2_ref.dtype).reshape(TB * 16, 84)
    s2 = [[None] * 2 for _ in range(2)]
    for p in range(2):
        for i in range(5):
            y = jnp.dot(h1, t2_ref[i, p], preferred_element_type=f32)
            y = y.reshape(TB, 16, 80)                         # rows: 7*e + u (+2 pad rows)
            for r in range(2):
                e, a = (r + i) % 2, (r + i) // 2
                term = y[:, 7 * e + a:7 * e + a + 5, :]
                s2[p][r] = term if s2[p][r] is None else s2[p][r] + term
    wm2 = [jnp.maximum(s2[0][r], s2[1][r]) for r in range(2)]
    p2_scr[...] = jnp.maximum(jnp.maximum(wm2[0], wm2[1]) + b2c_ref[...], 0.0)

    # ---------------- fc1 + ReLU -> fc2 + ReLU -> fc3 ----------------
    acc = None
    for h in range(5):
        v = p2_scr[:, h, :].astype(w1_ref.dtype)              # (TB, 80)
        z = jnp.dot(v, w1_ref[h], preferred_element_type=f32)
        acc = z if acc is None else acc + z
    a1 = jnp.maximum(acc + bf1_ref[...], 0.0).astype(w2_ref.dtype)
    a2 = jnp.dot(a1, w2_ref[...], preferred_element_type=f32) + bf2_ref[...]
    a2 = jnp.maximum(a2, 0.0).astype(w3_ref.dtype)
    logits = jnp.dot(a2, w3_ref[...], preferred_element_type=f32) + bf3_ref[...]
    out_ref[...] = logits.reshape(1, TB, 128)


# ----------------------------------------------------------------------------
# Wrapper-side (plain XLA) weight/layout preparation
# ----------------------------------------------------------------------------
def _conv_toeplitz(w_oihw, in_w, dtype):
    """Row-Toeplitz form of a 'valid' KHxKW conv, split by output-width parity.

    Returns T of shape (KH, 2, in_w*IC, (OW//2)*OC) so that for an input row laid
    out as row[w*IC + c], (row @ T[i, p])[owp*OC + oc] is the kernel-row-i partial
    sum of the conv output at width 2*owp + p.
    """
    OC, IC, KH, KW = w_oihw.shape
    OW = in_w - KW + 1
    wk = jnp.transpose(w_oihw, (2, 3, 1, 0))                    # (KH, KW, IC, OC)
    d = jnp.arange(in_w)[:, None] - jnp.arange(OW)[None, :]     # j = w - ow
    valid = (d >= 0) & (d < KW)
    g = wk[:, jnp.clip(d, 0, KW - 1), :, :]                     # (KH, in_w, OW, IC, OC)
    g = jnp.where(valid[None, :, :, None, None], g, 0.0)
    g = jnp.transpose(g, (0, 1, 3, 2, 4))                       # (KH, in_w, IC, OW, OC)
    g = jnp.stack([g[:, :, :, 0::2, :], g[:, :, :, 1::2, :]], axis=1)
    return g.reshape(KH, 2, in_w * IC, (OW // 2) * OC).astype(dtype)


def _fc1_weights(w_fc1, dtype):
    """fc1 weight (120, 400) -> (5, 80, 128): rows reordered from PyTorch's
    x.view(-1, 16*5*5) order (c*25 + h*5 + w) to the kernel's (h, w*16 + c)."""
    fout = w_fc1.shape[0]                                       # 120
    w = w_fc1.reshape(fout, 16, 5, 5)                           # (out, c, h, w)
    w = jnp.transpose(w, (2, 3, 1, 0)).reshape(5, 80, fout)     # (h, w*16+c, out)
    return jnp.pad(w, ((0, 0), (0, 0), (0, 128 - fout))).astype(dtype)


def convnet_forward(x_nchw, params, *, tile_batch=8, matmul_dtype=MATMUL_DTYPE):
    """Forward pass of the PyTorch ConvNet on NCHW float32 input (N, 3, 32, 32)."""
    (cw1, cb1) = params["conv1"]
    (cw2, cb2) = params["conv2"]
    (w1, b1), (w2, b2), (w3, b3) = params["fc"]
    N = x_nchw.shape[0]

    # Batch tile: small per-step VMEM working set (~1-2 MiB) on every generation,
    # and the grid always has >=2 steps when N >= 2 so both v7x TensorCores run.
    TB = max(1, min(tile_batch, -(-N // 2)))
    steps = -(-N // TB)
    npad = steps * TB

    # Input rows in (h%4, h//4, w*3+c) phase-split layout (one cheap XLA gather).
    x = jnp.transpose(x_nchw.astype(jnp.float32), (0, 2, 3, 1))   # NHWC
    x = x.reshape(N, 8, 4, 96).transpose(0, 2, 1, 3)              # (N, 4, 8, 96)
    x = jnp.pad(x, ((0, npad - N), (0, 0), (0, 0), (0, 0)))
    x = x.reshape(steps, TB, 4, 8, 96).astype(matmul_dtype)

    # Weights: all tiny, VMEM-resident across the whole grid (constant index_maps).
    t1 = _conv_toeplitz(cw1, 32, matmul_dtype)                    # (5, 2, 96, 84)
    t2 = _conv_toeplitz(cw2, 14, matmul_dtype)                    # (5, 2, 84, 80)
    b1c = jnp.tile(cb1.astype(jnp.float32), 14).reshape(1, 84)
    b2c = jnp.tile(cb2.astype(jnp.float32), 5).reshape(1, 80)
    w1p = _fc1_weights(w1, matmul_dtype)                          # (5, 80, 128)
    w2p = jnp.pad(w2.T, ((0, 128 - 120), (0, 128 - 84))).astype(matmul_dtype)
    w3p = jnp.pad(w3.T, ((0, 128 - 84), (0, 128 - 10))).astype(matmul_dtype)
    bf1 = jnp.pad(b1, (0, 128 - 120)).reshape(1, 128).astype(jnp.float32)
    bf2 = jnp.pad(b2, (0, 128 - 84)).reshape(1, 128).astype(jnp.float32)
    bf3 = jnp.pad(b3, (0, 128 - 10)).reshape(1, 128).astype(jnp.float32)

    def resident(arr):
        zeros = (0,) * arr.ndim
        return pl.BlockSpec(arr.shape, lambda i: zeros)

    out = pl.pallas_call(
        _convnet_kernel,
        out_shape=jax.ShapeDtypeStruct((steps, TB, 128), jnp.float32),
        grid=(steps,),
        in_specs=[
            pl.BlockSpec((1, TB, 4, 8, 96), lambda i: (i, 0, 0, 0, 0)),
            resident(t1), resident(b1c), resident(t2), resident(b2c),
            resident(w1p), resident(bf1), resident(w2p), resident(bf2),
            resident(w3p), resident(bf3),
        ],
        out_specs=pl.BlockSpec((1, TB, 128), lambda i: (i, 0, 0)),
        scratch_shapes=[
            pltpu.VMEM((TB, 16, 84), jnp.float32),   # pool1 activations
            pltpu.VMEM((TB, 5, 80), jnp.float32),    # pool2 activations
        ],
        compiler_params=pltpu.CompilerParams(dimension_semantics=("parallel",)),
    )(x, t1, b1c, t2, b2c, w1p, bf1, w2p, bf2, w3p, bf3)

    return out.reshape(npad, 128)[:N, :10]


# ----------------------------------------------------------------------------
# Pure-JAX reference (exact PyTorch ConvNet semantics) and demo
# ----------------------------------------------------------------------------
def convnet_reference(x_nchw, params):
    (cw1, cb1) = params["conv1"]
    (cw2, cb2) = params["conv2"]
    (w1, b1), (w2, b2), (w3, b3) = params["fc"]

    def conv_relu(x, w, b):
        y = jax.lax.conv_general_dilated(
            x, w, window_strides=(1, 1), padding="VALID",
            dimension_numbers=("NCHW", "OIHW", "NCHW"))
        return jax.nn.relu(y + b[None, :, None, None])

    def pool(x):
        n, c, h, w = x.shape
        return jnp.max(x.reshape(n, c, h // 2, 2, w // 2, 2), axis=(3, 5))

    x = pool(conv_relu(x_nchw, cw1, cb1))
    x = pool(conv_relu(x, cw2, cb2))
    x = x.reshape(x.shape[0], -1)                 # (N, 16*5*5) in (C, H, W) order
    x = jax.nn.relu(x @ w1.T + b1)
    x = jax.nn.relu(x @ w2.T + b2)
    return x @ w3.T + b3


def init_params(key):
    ks = jax.random.split(key, 10)
    s = 0.1
    return {
        "conv1": (s * jax.random.normal(ks[0], (6, 3, 5, 5), jnp.float32),
                  s * jax.random.normal(ks[1], (6,), jnp.float32)),
        "conv2": (s * jax.random.normal(ks[2], (16, 6, 5, 5), jnp.float32),
                  s * jax.random.normal(ks[3], (16,), jnp.float32)),
        "fc": (
            (s * jax.random.normal(ks[4], (120, 400), jnp.float32),
             s * jax.random.normal(ks[5], (120,), jnp.float32)),
            (s * jax.random.normal(ks[6], (84, 120), jnp.float32),
             s * jax.random.normal(ks[7], (84,), jnp.float32)),
            (s * jax.random.normal(ks[8], (10, 84), jnp.float32),
             s * jax.random.normal(ks[9], (10,), jnp.float32)),
        ),
    }


if __name__ == "__main__":
    x = jax.random.normal(jax.random.PRNGKey(0), (2, 3, 32, 32), jnp.float32)
    params = init_params(jax.random.PRNGKey(42))

    out = jax.block_until_ready(jax.jit(convnet_forward)(x, params))
    assert out.shape == (2, 10) and out.dtype == jnp.float32, (out.shape, out.dtype)

    ref = jax.block_until_ready(jax.jit(convnet_reference)(x, params))
    err = float(jnp.max(jnp.abs(out - ref)))
    scale = float(jnp.max(jnp.abs(ref)))
    # bf16 matmul operands (f32 accumulation) => small numeric drift vs f32 torch.
    assert err <= 0.1 * scale + 0.1, (err, scale)
    print("KERNEL_OK")
</pallas_src>

<mosaic_0001>
module attributes {stable_mosaic.version = 11 : i64} {
  func.func @_convnet_kernel(%arg0: i32, %arg1: memref<1x1x4x8x96xbf16, #tpu.memory_space<vmem>>, %arg2: memref<5x2x96x84xbf16, #tpu.memory_space<vmem>>, %arg3: memref<1x84xf32, #tpu.memory_space<vmem>>, %arg4: memref<5x2x84x80xbf16, #tpu.memory_space<vmem>>, %arg5: memref<1x80xf32, #tpu.memory_space<vmem>>, %arg6: memref<5x80x128xbf16, #tpu.memory_space<vmem>>, %arg7: memref<1x128xf32, #tpu.memory_space<vmem>>, %arg8: memref<128x128xbf16, #tpu.memory_space<vmem>>, %arg9: memref<1x128xf32, #tpu.memory_space<vmem>>, %arg10: memref<128x128xbf16, #tpu.memory_space<vmem>>, %arg11: memref<1x128xf32, #tpu.memory_space<vmem>>, %arg12: memref<1x1x128xf32, #tpu.memory_space<vmem>>, %arg13: memref<1x16x84xf32, #tpu.memory_space<vmem>>, %arg14: memref<1x5x80xf32, #tpu.memory_space<vmem>>) attributes {dimension_semantics = [#tpu.dimension_semantics<parallel>], iteration_bounds = array<i64: 2>, scalar_prefetch = 0 : i64, scratch_operands = 2 : i64, tpu.core_type = #tpu.core_type<tc>, window_params = [{transform_indices = @transform_0, window_bounds = array<i64: 1, 1, 4, 8, 96>}, {pipeline_mode = #tpu.pipeline_mode<synchronous>, transform_indices = @transform_1, window_bounds = array<i64: 5, 2, 96, 84>}, {pipeline_mode = #tpu.pipeline_mode<synchronous>, transform_indices = @transform_2, window_bounds = array<i64: 1, 84>}, {pipeline_mode = #tpu.pipeline_mode<synchronous>, transform_indices = @transform_3, window_bounds = array<i64: 5, 2, 84, 80>}, {pipeline_mode = #tpu.pipeline_mode<synchronous>, transform_indices = @transform_4, window_bounds = array<i64: 1, 80>}, {pipeline_mode = #tpu.pipeline_mode<synchronous>, transform_indices = @transform_5, window_bounds = array<i64: 5, 80, 128>}, {pipeline_mode = #tpu.pipeline_mode<synchronous>, transform_indices = @transform_6, window_bounds = array<i64: 1, 128>}, {pipeline_mode = #tpu.pipeline_mode<synchronous>, transform_indices = @transform_7, window_bounds = array<i64: 128, 128>}, {pipeline_mode = #tpu.pipeline_mode<synchronous>, transform_indices = @transform_8, window_bounds = array<i64: 1, 128>}, {pipeline_mode = #tpu.pipeline_mode<synchronous>, transform_indices = @transform_9, window_bounds = array<i64: 128, 128>}, {pipeline_mode = #tpu.pipeline_mode<synchronous>, transform_indices = @transform_10, window_bounds = array<i64: 1, 128>}, {transform_indices = @transform_11, window_bounds = array<i64: 1, 1, 128>}]} {
    %c0 = arith.constant 0 : index
    %c0_0 = arith.constant 0 : index
    %c0_1 = arith.constant 0 : index
    %c0_2 = arith.constant 0 : index
    %c0_3 = arith.constant 0 : index
    %0 = vector.load %arg1[%c0, %c0_0, %c0_1, %c0_2, %c0_3] : memref<1x1x4x8x96xbf16, #tpu.memory_space<vmem>>, vector<1x1x4x8x96xbf16>
    %1 = vector.shape_cast %0 : vector<1x1x4x8x96xbf16> to vector<1x4x8x96xbf16>
    %2 = vector.shape_cast %1 : vector<1x4x8x96xbf16> to vector<32x96xbf16>
    %c0_4 = arith.constant 0 : index
    %c0_5 = arith.constant 0 : index
    %c0_6 = arith.constant 0 : index
    %c0_7 = arith.constant 0 : index
    %3 = vector.load %arg2[%c0_4, %c0_5, %c0_6, %c0_7] : memref<5x2x96x84xbf16, #tpu.memory_space<vmem>>, vector<1x1x96x84xbf16>
    %4 = vector.shape_cast %3 : vector<1x1x96x84xbf16> to vector<96x84xbf16>
    %cst = arith.constant dense<0.000000e+00> : vector<32x84xf32>
    %5 = tpu.matmul %2, %4, %cst {dimension_numbers = #tpu.dot_dimension_numbers<[1], [0], [0], [1], [0, 0, 1, 1], [], []>} : vector<32x96xbf16>, vector<96x84xbf16>, vector<32x84xf32> -> vector<32x84xf32>
    %6 = vector.shape_cast %5 : vector<32x84xf32> to vector<1x4x8x84xf32>
    %7 = vector.extract_strided_slice %6 {offsets = [0, 0, 0, 0], sizes = [1, 1, 7, 84], strides = [1, 1, 1, 1]} : vector<1x4x8x84xf32> to vector<1x1x7x84xf32>
    %8 = vector.shape_cast %7 : vector<1x1x7x84xf32> to vector<1x7x84xf32>
    %9 = vector.extract_strided_slice %6 {offsets = [0, 1, 0, 0], sizes = [1, 1, 7, 84], strides = [1, 1, 1, 1]} : vector<1x4x8x84xf32> to vector<1x1x7x84xf32>
    %10 = vector.shape_cast %9 : vector<1x1x7x84xf32> to vector<1x7x84xf32>
    %11 = vector.extract_strided_slice %6 {offsets = [0, 2, 0, 0], sizes = [1, 1, 7, 84], strides = [1, 1, 1, 1]} : vector<1x4x8x84xf32> to vector<1x1x7x84xf32>
    %12 = vector.shape_cast %11 : vector<1x1x7x84xf32> to vector<1x7x84xf32>
    %13 = vector.extract_strided_slice %6 {offsets = [0, 3, 0, 0], sizes = [1, 1, 7, 84], strides = [1, 1, 1, 1]} : vector<1x4x8x84xf32> to vector<1x1x7x84xf32>
    %14 = vector.shape_cast %13 : vector<1x1x7x84xf32> to vector<1x7x84xf32>
    %c1 = arith.constant 1 : index
    %c0_8 = arith.constant 0 : index
    %c0_9 = arith.constant 0 : index
    %c0_10 = arith.constant 0 : index
    %15 = vector.load %arg2[%c1, %c0_8, %c0_9, %c0_10] : memref<5x2x96x84xbf16, #tpu.memory_space<vmem>>, vector<1x1x96x84xbf16>
    %16 = vector.shape_cast %15 : vector<1x1x96x84xbf16> to vector<96x84xbf16>
    %cst_11 = arith.constant dense<0.000000e+00> : vector<32x84xf32>
    %17 = tpu.matmul %2, %16, %cst_11 {dimension_numbers = #tpu.dot_dimension_numbers<[1], [0], [0], [1], [0, 0, 1, 1], [], []>} : vector<32x96xbf16>, vector<96x84xbf16>, vector<32x84xf32> -> vector<32x84xf32>
    %18 = vector.shape_cast %17 : vector<32x84xf32> to vector<1x4x8x84xf32>
    %19 = vector.extract_strided_slice %18 {offsets = [0, 1, 0, 0], sizes = [1, 1, 7, 84], strides = [1, 1, 1, 1]} : vector<1x4x8x84xf32> to vector<1x1x7x84xf32>
    %20 = vector.shape_cast %19 : vector<1x1x7x84xf32> to vector<1x7x84xf32>
    %21 = arith.addf %8, %20 : vector<1x7x84xf32>
    %22 = vector.extract_strided_slice %18 {offsets = [0, 2, 0, 0], sizes = [1, 1, 7, 84], strides = [1, 1, 1, 1]} : vector<1x4x8x84xf32> to vector<1x1x7x84xf32>
    %23 = vector.shape_cast %22 : vector<1x1x7x84xf32> to vector<1x7x84xf32>
    %24 = arith.addf %10, %23 : vector<1x7x84xf32>
    %25 = vector.extract_strided_slice %18 {offsets = [0, 3, 0, 0], sizes = [1, 1, 7, 84], strides = [1, 1, 1, 1]} : vector<1x4x8x84xf32> to vector<1x1x7x84xf32>
    %26 = vector.shape_cast %25 : vector<1x1x7x84xf32> to vector<1x7x84xf32>
    %27 = arith.addf %12, %26 : vector<1x7x84xf32>
    %28 = vector.extract_strided_slice %18 {offsets = [0, 0, 1, 0], sizes = [1, 1, 7, 84], strides = [1, 1, 1, 1]} : vector<1x4x8x84xf32> to vector<1x1x7x84xf32>
    %29 = vector.shape_cast %28 : vector<1x1x7x84xf32> to vector<1x7x84xf32>
    %30 = arith.addf %14, %29 : vector<1x7x84xf32>
    %c2 = arith.constant 2 : index
    %c0_12 = arith.constant 0 : index
    %c0_13 = arith.constant 0 : index
    %c0_14 = arith.constant 0 : index
    %31 = vector.load %arg2[%c2, %c0_12, %c0_13, %c0_14] : memref<5x2x96x84xbf16, #tpu.memory_space<vmem>>, vector<1x1x96x84xbf16>
    %32 = vector.shape_cast %31 : vector<1x1x96x84xbf16> to vector<96x84xbf16>
    %cst_15 = arith.constant dense<0.000000e+00> : vector<32x84xf32>
    %33 = tpu.matmul %2, %32, %cst_15 {dimension_numbers = #tpu.dot_dimension_numbers<[1], [0], [0], [1], [0, 0, 1, 1], [], []>} : vector<32x96xbf16>, vector<96x84xbf16>, vector<32x84xf32> -> vector<32x84xf32>
    %34 = vector.shape_cast %33 : vector<32x84xf32> to vector<1x4x8x84xf32>
    %35 = vector.extract_strided_slice %34 {offsets = [0, 2, 0, 0], sizes = [1, 1, 7, 84], strides = [1, 1, 1, 1]} : vector<1x4x8x84xf32> to vector<1x1x7x84xf32>
    %36 = vector.shape_cast %35 : vector<1x1x7x84xf32> to vector<1x7x84xf32>
    %37 = arith.addf %21, %36 : vector<1x7x84xf32>
    %38 = vector.extract_strided_slice %34 {offsets = [0, 3, 0, 0], sizes = [1, 1, 7, 84], strides = [1, 1, 1, 1]} : vector<1x4x8x84xf32> to vector<1x1x7x84xf32>
    %39 = vector.shape_cast %38 : vector<1x1x7x84xf32> to vector<1x7x84xf32>
    %40 = arith.addf %24, %39 : vector<1x7x84xf32>
    %41 = vector.extract_strided_slice %34 {offsets = [0, 0, 1, 0], sizes = [1, 1, 7, 84], strides = [1, 1, 1, 1]} : vector<1x4x8x84xf32> to vector<1x1x7x84xf32>
    %42 = vector.shape_cast %41 : vector<1x1x7x84xf32> to vector<1x7x84xf32>
    %43 = arith.addf %27, %42 : vector<1x7x84xf32>
    %44 = vector.extract_strided_slice %34 {offsets = [0, 1, 1, 0], sizes = [1, 1, 7, 84], strides = [1, 1, 1, 1]} : vector<1x4x8x84xf32> to vector<1x1x7x84xf32>
    %45 = vector.shape_cast %44 : vector<1x1x7x84xf32> to vector<1x7x84xf32>
    %46 = arith.addf %30, %45 : vector<1x7x84xf32>
    %c3 = arith.constant 3 : index
    %c0_16 = arith.constant 0 : index
    %c0_17 = arith.constant 0 : index
    %c0_18 = arith.constant 0 : index
    %47 = vector.load %arg2[%c3, %c0_16, %c0_17, %c0_18] : memref<5x2x96x84xbf16, #tpu.memory_space<vmem>>, vector<1x1x96x84xbf16>
    %48 = vector.shape_cast %47 : vector<1x1x96x84xbf16> to vector<96x84xbf16>
    %cst_19 = arith.constant dense<0.000000e+00> : vector<32x84xf32>
    %49 = tpu.matmul %2, %48, %cst_19 {dimension_numbers = #tpu.dot_dimension_numbers<[1], [0], [0], [1], [0, 0, 1, 1], [], []>} : vector<32x96xbf16>, vector<96x84xbf16>, vector<32x84xf32> -> vector<32x84xf32>
    %50 = vector.shape_cast %49 : vector<32x84xf32> to vector<1x4x8x84xf32>
    %51 = vector.extract_strided_slice %50 {offsets = [0, 3, 0, 0], sizes = [1, 1, 7, 84], strides = [1, 1, 1, 1]} : vector<1x4x8x84xf32> to vector<1x1x7x84xf32>
    %52 = vector.shape_cast %51 : vector<1x1x7x84xf32> to vector<1x7x84xf32>
    %53 = arith.addf %37, %52 : vector<1x7x84xf32>
    %54 = vector.extract_strided_slice %50 {offsets = [0, 0, 1, 0], sizes = [1, 1, 7, 84], strides = [1, 1, 1, 1]} : vector<1x4x8x84xf32> to vector<1x1x7x84xf32>
    %55 = vector.shape_cast %54 : vector<1x1x7x84xf32> to vector<1x7x84xf32>
    %56 = arith.addf %40, %55 : vector<1x7x84xf32>
    %57 = vector.extract_strided_slice %50 {offsets = [0, 1, 1, 0], sizes = [1, 1, 7, 84], strides = [1, 1, 1, 1]} : vector<1x4x8x84xf32> to vector<1x1x7x84xf32>
    %58 = vector.shape_cast %57 : vector<1x1x7x84xf32> to vector<1x7x84xf32>
    %59 = arith.addf %43, %58 : vector<1x7x84xf32>
    %60 = vector.extract_strided_slice %50 {offsets = [0, 2, 1, 0], sizes = [1, 1, 7, 84], strides = [1, 1, 1, 1]} : vector<1x4x8x84xf32> to vector<1x1x7x84xf32>
    %61 = vector.shape_cast %60 : vector<1x1x7x84xf32> to vector<1x7x84xf32>
    %62 = arith.addf %46, %61 : vector<1x7x84xf32>
    %c4 = arith.constant 4 : index
    %c0_20 = arith.constant 0 : index
    %c0_21 = arith.constant 0 : index
    %c0_22 = arith.constant 0 : index
    %63 = vector.load %arg2[%c4, %c0_20, %c0_21, %c0_22] : memref<5x2x96x84xbf16, #tpu.memory_space<vmem>>, vector<1x1x96x84xbf16>
    %64 = vector.shape_cast %63 : vector<1x1x96x84xbf16> to vector<96x84xbf16>
    %cst_23 = arith.constant dense<0.000000e+00> : vector<32x84xf32>
    %65 = tpu.matmul %2, %64, %cst_23 {dimension_numbers = #tpu.dot_dimension_numbers<[1], [0], [0], [1], [0, 0, 1, 1], [], []>} : vector<32x96xbf16>, vector<96x84xbf16>, vector<32x84xf32> -> vector<32x84xf32>
    %66 = vector.shape_cast %65 : vector<32x84xf32> to vector<1x4x8x84xf32>
    %67 = vector.extract_strided_slice %66 {offsets = [0, 0, 1, 0], sizes = [1, 1, 7, 84], strides = [1, 1, 1, 1]} : vector<1x4x8x84xf32> to vector<1x1x7x84xf32>
    %68 = vector.shape_cast %67 : vector<1x1x7x84xf32> to vector<1x7x84xf32>
    %69 = arith.addf %53, %68 : vector<1x7x84xf32>
    %70 = vector.extract_strided_slice %66 {offsets = [0, 1, 1, 0], sizes = [1, 1, 7, 84], strides = [1, 1, 1, 1]} : vector<1x4x8x84xf32> to vector<1x1x7x84xf32>
    %71 = vector.shape_cast %70 : vector<1x1x7x84xf32> to vector<1x7x84xf32>
    %72 = arith.addf %56, %71 : vector<1x7x84xf32>
    %73 = vector.extract_strided_slice %66 {offsets = [0, 2, 1, 0], sizes = [1, 1, 7, 84], strides = [1, 1, 1, 1]} : vector<1x4x8x84xf32> to vector<1x1x7x84xf32>
    %74 = vector.shape_cast %73 : vector<1x1x7x84xf32> to vector<1x7x84xf32>
    %75 = arith.addf %59, %74 : vector<1x7x84xf32>
    %76 = vector.extract_strided_slice %66 {offsets = [0, 3, 1, 0], sizes = [1, 1, 7, 84], strides = [1, 1, 1, 1]} : vector<1x4x8x84xf32> to vector<1x1x7x84xf32>
    %77 = vector.shape_cast %76 : vector<1x1x7x84xf32> to vector<1x7x84xf32>
    %78 = arith.addf %62, %77 : vector<1x7x84xf32>
    %c0_24 = arith.constant 0 : index
    %c1_25 = arith.constant 1 : index
    %c0_26 = arith.constant 0 : index
    %c0_27 = arith.constant 0 : index
    %79 = vector.load %arg2[%c0_24, %c1_25, %c0_26, %c0_27] : memref<5x2x96x84xbf16, #tpu.memory_space<vmem>>, vector<1x1x96x84xbf16>
    %80 = vector.shape_cast %79 : vector<1x1x96x84xbf16> to vector<96x84xbf16>
    %cst_28 = arith.constant dense<0.000000e+00> : vector<32x84xf32>
    %81 = tpu.matmul %2, %80, %cst_28 {dimension_numbers = #tpu.dot_dimension_numbers<[1], [0], [0], [1], [0, 0, 1, 1], [], []>} : vector<32x96xbf16>, vector<96x84xbf16>, vector<32x84xf32> -> vector<32x84xf32>
    %82 = vector.shape_cast %81 : vector<32x84xf32> to vector<1x4x8x84xf32>
    %83 = vector.extract_strided_slice %82 {offsets = [0, 0, 0, 0], sizes = [1, 1, 7, 84], strides = [1, 1, 1, 1]} : vector<1x4x8x84xf32> to vector<1x1x7x84xf32>
    %84 = vector.shape_cast %83 : vector<1x1x7x84xf32> to vector<1x7x84xf32>
    %85 = vector.extract_strided_slice %82 {offsets = [0, 1, 0, 0], sizes = [1, 1, 7, 84], strides = [1, 1, 1, 1]} : vector<1x4x8x84xf32> to vector<1x1x7x84xf32>
    %86 = vector.shape_cast %85 : vector<1x1x7x84xf32> to vector<1x7x84xf32>
    %87 = vector.extract_strided_slice %82 {offsets = [0, 2, 0, 0], sizes = [1, 1, 7, 84], strides = [1, 1, 1, 1]} : vector<1x4x8x84xf32> to vector<1x1x7x84xf32>
    %88 = vector.shape_cast %87 : vector<1x1x7x84xf32> to vector<1x7x84xf32>
    %89 = vector.extract_strided_slice %82 {offsets = [0, 3, 0, 0], sizes = [1, 1, 7, 84], strides = [1, 1, 1, 1]} : vector<1x4x8x84xf32> to vector<1x1x7x84xf32>
    %90 = vector.shape_cast %89 : vector<1x1x7x84xf32> to vector<1x7x84xf32>
    %c1_29 = arith.constant 1 : index
    %c1_30 = arith.constant 1 : index
    %c0_31 = arith.constant 0 : index
    %c0_32 = arith.constant 0 : index
    %91 = vector.load %arg2[%c1_29, %c1_30, %c0_31, %c0_32] : memref<5x2x96x84xbf16, #tpu.memory_space<vmem>>, vector<1x1x96x84xbf16>
    %92 = vector.shape_cast %91 : vector<1x1x96x84xbf16> to vector<96x84xbf16>
    %cst_33 = arith.constant dense<0.000000e+00> : vector<32x84xf32>
    %93 = tpu.matmul %2, %92, %cst_33 {dimension_numbers = #tpu.dot_dimension_numbers<[1], [0], [0], [1], [0, 0, 1, 1], [], []>} : vector<32x96xbf16>, vector<96x84xbf16>, vector<32x84xf32> -> vector<32x84xf32>
    %94 = vector.shape_cast %93 : vector<32x84xf32> to vector<1x4x8x84xf32>
    %95 = vector.extract_strided_slice %94 {offsets = [0, 1, 0, 0], sizes = [1, 1, 7, 84], strides = [1, 1, 1, 1]} : vector<1x4x8x84xf32> to vector<1x1x7x84xf32>
    %96 = vector.shape_cast %95 : vector<1x1x7x84xf32> to vector<1x7x84xf32>
    %97 = arith.addf %84, %96 : vector<1x7x84xf32>
    %98 = vector.extract_strided_slice %94 {offsets = [0, 2, 0, 0], sizes = [1, 1, 7, 84], strides = [1, 1, 1, 1]} : vector<1x4x8x84xf32> to vector<1x1x7x84xf32>
    %99 = vector.shape_cast %98 : vector<1x1x7x84xf32> to vector<1x7x84xf32>
    %100 = arith.addf %86, %99 : vector<1x7x84xf32>
    %101 = vector.extract_strided_slice %94 {offsets = [0, 3, 0, 0], sizes = [1, 1, 7, 84], strides = [1, 1, 1, 1]} : vector<1x4x8x84xf32> to vector<1x1x7x84xf32>
    %102 = vector.shape_cast %101 : vector<1x1x7x84xf32> to vector<1x7x84xf32>
    %103 = arith.addf %88, %102 : vector<1x7x84xf32>
    %104 = vector.extract_strided_slice %94 {offsets = [0, 0, 1, 0], sizes = [1, 1, 7, 84], strides = [1, 1, 1, 1]} : vector<1x4x8x84xf32> to vector<1x1x7x84xf32>
    %105 = vector.shape_cast %104 : vector<1x1x7x84xf32> to vector<1x7x84xf32>
    %106 = arith.addf %90, %105 : vector<1x7x84xf32>
    %c2_34 = arith.constant 2 : index
    %c1_35 = arith.constant 1 : index
    %c0_36 = arith.constant 0 : index
    %c0_37 = arith.constant 0 : index
    %107 = vector.load %arg2[%c2_34, %c1_35, %c0_36, %c0_37] : memref<5x2x96x84xbf16, #tpu.memory_space<vmem>>, vector<1x1x96x84xbf16>
    %108 = vector.shape_cast %107 : vector<1x1x96x84xbf16> to vector<96x84xbf16>
    %cst_38 = arith.constant dense<0.000000e+00> : vector<32x84xf32>
    %109 = tpu.matmul %2, %108, %cst_38 {dimension_numbers = #tpu.dot_dimension_numbers<[1], [0], [0], [1], [0, 0, 1, 1], [], []>} : vector<32x96xbf16>, vector<96x84xbf16>, vector<32x84xf32> -> vector<32x84xf32>
    %110 = vector.shape_cast %109 : vector<32x84xf32> to vector<1x4x8x84xf32>
    %111 = vector.extract_strided_slice %110 {offsets = [0, 2, 0, 0], sizes = [1, 1, 7, 84], strides = [1, 1, 1, 1]} : vector<1x4x8x84xf32> to vector<1x1x7x84xf32>
    %112 = vector.shape_cast %111 : vector<1x1x7x84xf32> to vector<1x7x84xf32>
    %113 = arith.addf %97, %112 : vector<1x7x84xf32>
    %114 = vector.extract_strided_slice %110 {offsets = [0, 3, 0, 0], sizes = [1, 1, 7, 84], strides = [1, 1, 1, 1]} : vector<1x4x8x84xf32> to vector<1x1x7x84xf32>
    %115 = vector.shape_cast %114 : vector<1x1x7x84xf32> to vector<1x7x84xf32>
    %116 = arith.addf %100, %115 : vector<1x7x84xf32>
    %117 = vector.extract_strided_slice %110 {offsets = [0, 0, 1, 0], sizes = [1, 1, 7, 84], strides = [1, 1, 1, 1]} : vector<1x4x8x84xf32> to vector<1x1x7x84xf32>
    %118 = vector.shape_cast %117 : vector<1x1x7x84xf32> to vector<1x7x84xf32>
    %119 = arith.addf %103, %118 : vector<1x7x84xf32>
    %120 = vector.extract_strided_slice %110 {offsets = [0, 1, 1, 0], sizes = [1, 1, 7, 84], strides = [1, 1, 1, 1]} : vector<1x4x8x84xf32> to vector<1x1x7x84xf32>
    %121 = vector.shape_cast %120 : vector<1x1x7x84xf32> to vector<1x7x84xf32>
    %122 = arith.addf %106, %121 : vector<1x7x84xf32>
    %c3_39 = arith.constant 3 : index
    %c1_40 = arith.constant 1 : index
    %c0_41 = arith.constant 0 : index
    %c0_42 = arith.constant 0 : index
    %123 = vector.load %arg2[%c3_39, %c1_40, %c0_41, %c0_42] : memref<5x2x96x84xbf16, #tpu.memory_space<vmem>>, vector<1x1x96x84xbf16>
    %124 = vector.shape_cast %123 : vector<1x1x96x84xbf16> to vector<96x84xbf16>
    %cst_43 = arith.constant dense<0.000000e+00> : vector<32x84xf32>
    %125 = tpu.matmul %2, %124, %cst_43 {dimension_numbers = #tpu.dot_dimension_numbers<[1], [0], [0], [1], [0, 0, 1, 1], [], []>} : vector<32x96xbf16>, vector<96x84xbf16>, vector<32x84xf32> -> vector<32x84xf32>
    %126 = vector.shape_cast %125 : vector<32x84xf32> to vector<1x4x8x84xf32>
    %127 = vector.extract_strided_slice %126 {offsets = [0, 3, 0, 0], sizes = [1, 1, 7, 84], strides = [1, 1, 1, 1]} : vector<1x4x8x84xf32> to vector<1x1x7x84xf32>
    %128 = vector.shape_cast %127 : vector<1x1x7x84xf32> to vector<1x7x84xf32>
    %129 = arith.addf %113, %128 : vector<1x7x84xf32>
    %130 = vector.extract_strided_slice %126 {offsets = [0, 0, 1, 0], sizes = [1, 1, 7, 84], strides = [1, 1, 1, 1]} : vector<1x4x8x84xf32> to vector<1x1x7x84xf32>
    %131 = vector.shape_cast %130 : vector<1x1x7x84xf32> to vector<1x7x84xf32>
    %132 = arith.addf %116, %131 : vector<1x7x84xf32>
    %133 = vector.extract_strided_slice %126 {offsets = [0, 1, 1, 0], sizes = [1, 1, 7, 84], strides = [1, 1, 1, 1]} : vector<1x4x8x84xf32> to vector<1x1x7x84xf32>
    %134 = vector.shape_cast %133 : vector<1x1x7x84xf32> to vector<1x7x84xf32>
    %135 = arith.addf %119, %134 : vector<1x7x84xf32>
    %136 = vector.extract_strided_slice %126 {offsets = [0, 2, 1, 0], sizes = [1, 1, 7, 84], strides = [1, 1, 1, 1]} : vector<1x4x8x84xf32> to vector<1x1x7x84xf32>
    %137 = vector.shape_cast %136 : vector<1x1x7x84xf32> to vector<1x7x84xf32>
    %138 = arith.addf %122, %137 : vector<1x7x84xf32>
    %c4_44 = arith.constant 4 : index
    %c1_45 = arith.constant 1 : index
    %c0_46 = arith.constant 0 : index
    %c0_47 = arith.constant 0 : index
    %139 = vector.load %arg2[%c4_44, %c1_45, %c0_46, %c0_47] : memref<5x2x96x84xbf16, #tpu.memory_space<vmem>>, vector<1x1x96x84xbf16>
    %140 = vector.shape_cast %139 : vector<1x1x96x84xbf16> to vector<96x84xbf16>
    %cst_48 = arith.constant dense<0.000000e+00> : vector<32x84xf32>
    %141 = tpu.matmul %2, %140, %cst_48 {dimension_numbers = #tpu.dot_dimension_numbers<[1], [0], [0], [1], [0, 0, 1, 1], [], []>} : vector<32x96xbf16>, vector<96x84xbf16>, vector<32x84xf32> -> vector<32x84xf32>
    %142 = vector.shape_cast %141 : vector<32x84xf32> to vector<1x4x8x84xf32>
    %143 = vector.extract_strided_slice %142 {offsets = [0, 0, 1, 0], sizes = [1, 1, 7, 84], strides = [1, 1, 1, 1]} : vector<1x4x8x84xf32> to vector<1x1x7x84xf32>
    %144 = vector.shape_cast %143 : vector<1x1x7x84xf32> to vector<1x7x84xf32>
    %145 = arith.addf %129, %144 : vector<1x7x84xf32>
    %146 = vector.extract_strided_slice %142 {offsets = [0, 1, 1, 0], sizes = [1, 1, 7, 84], strides = [1, 1, 1, 1]} : vector<1x4x8x84xf32> to vector<1x1x7x84xf32>
    %147 = vector.shape_cast %146 : vector<1x1x7x84xf32> to vector<1x7x84xf32>
    %148 = arith.addf %132, %147 : vector<1x7x84xf32>
    %149 = vector.extract_strided_slice %142 {offsets = [0, 2, 1, 0], sizes = [1, 1, 7, 84], strides = [1, 1, 1, 1]} : vector<1x4x8x84xf32> to vector<1x1x7x84xf32>
    %150 = vector.shape_cast %149 : vector<1x1x7x84xf32> to vector<1x7x84xf32>
    %151 = arith.addf %135, %150 : vector<1x7x84xf32>
    %152 = vector.extract_strided_slice %142 {offsets = [0, 3, 1, 0], sizes = [1, 1, 7, 84], strides = [1, 1, 1, 1]} : vector<1x4x8x84xf32> to vector<1x1x7x84xf32>
    %153 = vector.shape_cast %152 : vector<1x1x7x84xf32> to vector<1x7x84xf32>
    %154 = arith.addf %138, %153 : vector<1x7x84xf32>
    %155 = arith.maximumf %69, %145 : vector<1x7x84xf32>
    %156 = arith.maximumf %72, %148 : vector<1x7x84xf32>
    %157 = arith.maximumf %75, %151 : vector<1x7x84xf32>
    %158 = arith.maximumf %78, %154 : vector<1x7x84xf32>
    %159 = arith.maximumf %155, %156 : vector<1x7x84xf32>
    %c0_49 = arith.constant 0 : index
    %c0_50 = arith.constant 0 : index
    %160 = vector.load %arg3[%c0_49, %c0_50] : memref<1x84xf32, #tpu.memory_space<vmem>>, vector<1x84xf32>
    %161 = vector.shape_cast %160 : vector<1x84xf32> to vector<1x1x84xf32>
    %162 = vector.broadcast %161 : vector<1x1x84xf32> to vector<1x7x84xf32>
    %163 = arith.addf %159, %162 : vector<1x7x84xf32>
    %cst_51 = arith.constant 0.000000e+00 : f32
    %164 = vector.broadcast %cst_51 : f32 to vector<1x7x84xf32>
    %165 = arith.maximumf %163, %164 : vector<1x7x84xf32>
    %c0_52 = arith.constant 0 : index
    %c0_53 = arith.constant 0 : index
    %c0_54 = arith.constant 0 : index
    %166 = vector.load %arg13[%c0_52, %c0_53, %c0_54] : memref<1x16x84xf32, #tpu.memory_space<vmem>>, vector<1x7x84xf32>
    tpu.vector_store %arg13[%c0_52, %c0_53, %c0_54], %165 {strides = array<i32>} : memref<1x16x84xf32, #tpu.memory_space<vmem>>, vector<1x7x84xf32>,
    %167 = arith.maximumf %157, %158 : vector<1x7x84xf32>
    %c0_55 = arith.constant 0 : index
    %c0_56 = arith.constant 0 : index
    %168 = vector.load %arg3[%c0_55, %c0_56] : memref<1x84xf32, #tpu.memory_space<vmem>>, vector<1x84xf32>
    %169 = vector.shape_cast %168 : vector<1x84xf32> to vector<1x1x84xf32>
    %170 = vector.broadcast %169 : vector<1x1x84xf32> to vector<1x7x84xf32>
    %171 = arith.addf %167, %170 : vector<1x7x84xf32>
    %cst_57 = arith.constant 0.000000e+00 : f32
    %172 = vector.broadcast %cst_57 : f32 to vector<1x7x84xf32>
    %173 = arith.maximumf %171, %172 : vector<1x7x84xf32>
    %c0_58 = arith.constant 0 : index
    %c7 = arith.constant 7 : index
    %c0_59 = arith.constant 0 : index
    %174 = vector.load %arg13[%c0_58, %c7, %c0_59] : memref<1x16x84xf32, #tpu.memory_space<vmem>>, vector<1x7x84xf32>
    tpu.vector_store %arg13[%c0_58, %c7, %c0_59], %173 {strides = array<i32>} : memref<1x16x84xf32, #tpu.memory_space<vmem>>, vector<1x7x84xf32>,
    %cst_60 = arith.constant 0.000000e+00 : f32
    %175 = vector.broadcast %cst_60 : f32 to vector<1x2x84xf32>
    %c0_61 = arith.constant 0 : index
    %c14 = arith.constant 14 : index
    %c0_62 = arith.constant 0 : index
    %176 = vector.load %arg13[%c0_61, %c14, %c0_62] : memref<1x16x84xf32, #tpu.memory_space<vmem>>, vector<1x2x84xf32>
    tpu.vector_store %arg13[%c0_61, %c14, %c0_62], %175 {strides = array<i32>} : memref<1x16x84xf32, #tpu.memory_space<vmem>>, vector<1x2x84xf32>,
    %c0_63 = arith.constant 0 : index
    %c0_64 = arith.constant 0 : index
    %c0_65 = arith.constant 0 : index
    %177 = vector.load %arg13[%c0_63, %c0_64, %c0_65] : memref<1x16x84xf32, #tpu.memory_space<vmem>>, vector<1x16x84xf32>
    %178 = arith.truncf %177 : vector<1x16x84xf32> to vector<1x16x84xbf16>
    %179 = vector.shape_cast %178 : vector<1x16x84xbf16> to vector<16x84xbf16>
    %c0_66 = arith.constant 0 : index
    %c0_67 = arith.constant 0 : index
    %c0_68 = arith.constant 0 : index
    %c0_69 = arith.constant 0 : index
    %180 = vector.load %arg4[%c0_66, %c0_67, %c0_68, %c0_69] : memref<5x2x84x80xbf16, #tpu.memory_space<vmem>>, vector<1x1x84x80xbf16>
    %181 = vector.shape_cast %180 : vector<1x1x84x80xbf16> to vector<84x80xbf16>
    %cst_70 = arith.constant dense<0.000000e+00> : vector<16x80xf32>
    %182 = tpu.matmul %179, %181, %cst_70 {dimension_numbers = #tpu.dot_dimension_numbers<[1], [0], [0], [1], [0, 0, 1, 1], [], []>} : vector<16x84xbf16>, vector<84x80xbf16>, vector<16x80xf32> -> vector<16x80xf32>
    %183 = vector.shape_cast %182 : vector<16x80xf32> to vector<1x16x80xf32>
    %184 = vector.extract_strided_slice %183 {offsets = [0, 0, 0], sizes = [1, 5, 80], strides = [1, 1, 1]} : vector<1x16x80xf32> to vector<1x5x80xf32>
    %185 = vector.extract_strided_slice %183 {offsets = [0, 7, 0], sizes = [1, 5, 80], strides = [1, 1, 1]} : vector<1x16x80xf32> to vector<1x5x80xf32>
    %c1_71 = arith.constant 1 : index
    %c0_72 = arith.constant 0 : index
    %c0_73 = arith.constant 0 : index
    %c0_74 = arith.constant 0 : index
    %186 = vector.load %arg4[%c1_71, %c0_72, %c0_73, %c0_74] : memref<5x2x84x80xbf16, #tpu.memory_space<vmem>>, vector<1x1x84x80xbf16>
    %187 = vector.shape_cast %186 : vector<1x1x84x80xbf16> to vector<84x80xbf16>
    %cst_75 = arith.constant dense<0.000000e+00> : vector<16x80xf32>
    %188 = tpu.matmul %179, %187, %cst_75 {dimension_numbers = #tpu.dot_dimension_numbers<[1], [0], [0], [1], [0, 0, 1, 1], [], []>} : vector<16x84xbf16>, vector<84x80xbf16>, vector<16x80xf32> -> vector<16x80xf32>
    %189 = vector.shape_cast %188 : vector<16x80xf32> to vector<1x16x80xf32>
    %190 = vector.extract_strided_slice %189 {offsets = [0, 7, 0], sizes = [1, 5, 80], strides = [1, 1, 1]} : vector<1x16x80xf32> to vector<1x5x80xf32>
    %191 = arith.addf %184, %190 : vector<1x5x80xf32>
    %192 = vector.extract_strided_slice %189 {offsets = [0, 1, 0], sizes = [1, 5, 80], strides = [1, 1, 1]} : vector<1x16x80xf32> to vector<1x5x80xf32>
    %193 = arith.addf %185, %192 : vector<1x5x80xf32>
    %c2_76 = arith.constant 2 : index
    %c0_77 = arith.constant 0 : index
    %c0_78 = arith.constant 0 : index
    %c0_79 = arith.constant 0 : index
    %194 = vector.load %arg4[%c2_76, %c0_77, %c0_78, %c0_79] : memref<5x2x84x80xbf16, #tpu.memory_space<vmem>>, vector<1x1x84x80xbf16>
    %195 = vector.shape_cast %194 : vector<1x1x84x80xbf16> to vector<84x80xbf16>
    %cst_80 = arith.constant dense<0.000000e+00> : vector<16x80xf32>
    %196 = tpu.matmul %179, %195, %cst_80 {dimension_numbers = #tpu.dot_dimension_numbers<[1], [0], [0], [1], [0, 0, 1, 1], [], []>} : vector<16x84xbf16>, vector<84x80xbf16>, vector<16x80xf32> -> vector<16x80xf32>
    %197 = vector.shape_cast %196 : vector<16x80xf32> to vector<1x16x80xf32>
    %198 = vector.extract_strided_slice %197 {offsets = [0, 1, 0], sizes = [1, 5, 80], strides = [1, 1, 1]} : vector<1x16x80xf32> to vector<1x5x80xf32>
    %199 = arith.addf %191, %198 : vector<1x5x80xf32>
    %200 = vector.extract_strided_slice %197 {offsets = [0, 8, 0], sizes = [1, 5, 80], strides = [1, 1, 1]} : vector<1x16x80xf32> to vector<1x5x80xf32>
    %201 = arith.addf %193, %200 : vector<1x5x80xf32>
    %c3_81 = arith.constant 3 : index
    %c0_82 = arith.constant 0 : index
    %c0_83 = arith.constant 0 : index
    %c0_84 = arith.constant 0 : index
    %202 = vector.load %arg4[%c3_81, %c0_82, %c0_83, %c0_84] : memref<5x2x84x80xbf16, #tpu.memory_space<vmem>>, vector<1x1x84x80xbf16>
    %203 = vector.shape_cast %202 : vector<1x1x84x80xbf16> to vector<84x80xbf16>
    %cst_85 = arith.constant dense<0.000000e+00> : vector<16x80xf32>
    %204 = tpu.matmul %179, %203, %cst_85 {dimension_numbers = #tpu.dot_dimension_numbers<[1], [0], [0], [1], [0, 0, 1, 1], [], []>} : vector<16x84xbf16>, vector<84x80xbf16>, vector<16x80xf32> -> vector<16x80xf32>
    %205 = vector.shape_cast %204 : vector<16x80xf32> to vector<1x16x80xf32>
    %206 = vector.extract_strided_slice %205 {offsets = [0, 8, 0], sizes = [1, 5, 80], strides = [1, 1, 1]} : vector<1x16x80xf32> to vector<1x5x80xf32>
    %207 = arith.addf %199, %206 : vector<1x5x80xf32>
    %208 = vector.extract_strided_slice %205 {offsets = [0, 2, 0], sizes = [1, 5, 80], strides = [1, 1, 1]} : vector<1x16x80xf32> to vector<1x5x80xf32>
    %209 = arith.addf %201, %208 : vector<1x5x80xf32>
    %c4_86 = arith.constant 4 : index
    %c0_87 = arith.constant 0 : index
    %c0_88 = arith.constant 0 : index
    %c0_89 = arith.constant 0 : index
    %210 = vector.load %arg4[%c4_86, %c0_87, %c0_88, %c0_89] : memref<5x2x84x80xbf16, #tpu.memory_space<vmem>>, vector<1x1x84x80xbf16>
    %211 = vector.shape_cast %210 : vector<1x1x84x80xbf16> to vector<84x80xbf16>
    %cst_90 = arith.constant dense<0.000000e+00> : vector<16x80xf32>
    %212 = tpu.matmul %179, %211, %cst_90 {dimension_numbers = #tpu.dot_dimension_numbers<[1], [0], [0], [1], [0, 0, 1, 1], [], []>} : vector<16x84xbf16>, vector<84x80xbf16>, vector<16x80xf32> -> vector<16x80xf32>
    %213 = vector.shape_cast %212 : vector<16x80xf32> to vector<1x16x80xf32>
    %214 = vector.extract_strided_slice %213 {offsets = [0, 2, 0], sizes = [1, 5, 80], strides = [1, 1, 1]} : vector<1x16x80xf32> to vector<1x5x80xf32>
    %215 = arith.addf %207, %214 : vector<1x5x80xf32>
    %216 = vector.extract_strided_slice %213 {offsets = [0, 9, 0], sizes = [1, 5, 80], strides = [1, 1, 1]} : vector<1x16x80xf32> to vector<1x5x80xf32>
    %217 = arith.addf %209, %216 : vector<1x5x80xf32>
    %c0_91 = arith.constant 0 : index
    %c1_92 = arith.constant 1 : index
    %c0_93 = arith.constant 0 : index
    %c0_94 = arith.constant 0 : index
    %218 = vector.load %arg4[%c0_91, %c1_92, %c0_93, %c0_94] : memref<5x2x84x80xbf16, #tpu.memory_space<vmem>>, vector<1x1x84x80xbf16>
    %219 = vector.shape_cast %218 : vector<1x1x84x80xbf16> to vector<84x80xbf16>
    %cst_95 = arith.constant dense<0.000000e+00> : vector<16x80xf32>
    %220 = tpu.matmul %179, %219, %cst_95 {dimension_numbers = #tpu.dot_dimension_numbers<[1], [0], [0], [1], [0, 0, 1, 1], [], []>} : vector<16x84xbf16>, vector<84x80xbf16>, vector<16x80xf32> -> vector<16x80xf32>
    %221 = vector.shape_cast %220 : vector<16x80xf32> to vector<1x16x80xf32>
    %222 = vector.extract_strided_slice %221 {offsets = [0, 0, 0], sizes = [1, 5, 80], strides = [1, 1, 1]} : vector<1x16x80xf32> to vector<1x5x80xf32>
    %223 = vector.extract_strided_slice %221 {offsets = [0, 7, 0], sizes = [1, 5, 80], strides = [1, 1, 1]} : vector<1x16x80xf32> to vector<1x5x80xf32>
    %c1_96 = arith.constant 1 : index
    %c1_97 = arith.constant 1 : index
    %c0_98 = arith.constant 0 : index
    %c0_99 = arith.constant 0 : index
    %224 = vector.load %arg4[%c1_96, %c1_97, %c0_98, %c0_99] : memref<5x2x84x80xbf16, #tpu.memory_space<vmem>>, vector<1x1x84x80xbf16>
    %225 = vector.shape_cast %224 : vector<1x1x84x80xbf16> to vector<84x80xbf16>
    %cst_100 = arith.constant dense<0.000000e+00> : vector<16x80xf32>
    %226 = tpu.matmul %179, %225, %cst_100 {dimension_numbers = #tpu.dot_dimension_numbers<[1], [0], [0], [1], [0, 0, 1, 1], [], []>} : vector<16x84xbf16>, vector<84x80xbf16>, vector<16x80xf32> -> vector<16x80xf32>
    %227 = vector.shape_cast %226 : vector<16x80xf32> to vector<1x16x80xf32>
    %228 = vector.extract_strided_slice %227 {offsets = [0, 7, 0], sizes = [1, 5, 80], strides = [1, 1, 1]} : vector<1x16x80xf32> to vector<1x5x80xf32>
    %229 = arith.addf %222, %228 : vector<1x5x80xf32>
    %230 = vector.extract_strided_slice %227 {offsets = [0, 1, 0], sizes = [1, 5, 80], strides = [1, 1, 1]} : vector<1x16x80xf32> to vector<1x5x80xf32>
    %231 = arith.addf %223, %230 : vector<1x5x80xf32>
    %c2_101 = arith.constant 2 : index
    %c1_102 = arith.constant 1 : index
    %c0_103 = arith.constant 0 : index
    %c0_104 = arith.constant 0 : index
    %232 = vector.load %arg4[%c2_101, %c1_102, %c0_103, %c0_104] : memref<5x2x84x80xbf16, #tpu.memory_space<vmem>>, vector<1x1x84x80xbf16>
    %233 = vector.shape_cast %232 : vector<1x1x84x80xbf16> to vector<84x80xbf16>
    %cst_105 = arith.constant dense<0.000000e+00> : vector<16x80xf32>
    %234 = tpu.matmul %179, %233, %cst_105 {dimension_numbers = #tpu.dot_dimension_numbers<[1], [0], [0], [1], [0, 0, 1, 1], [], []>} : vector<16x84xbf16>, vector<84x80xbf16>, vector<16x80xf32> -> vector<16x80xf32>
    %235 = vector.shape_cast %234 : vector<16x80xf32> to vector<1x16x80xf32>
    %236 = vector.extract_strided_slice %235 {offsets = [0, 1, 0], sizes = [1, 5, 80], strides = [1, 1, 1]} : vector<1x16x80xf32> to vector<1x5x80xf32>
    %237 = arith.addf %229, %236 : vector<1x5x80xf32>
    %238 = vector.extract_strided_slice %235 {offsets = [0, 8, 0], sizes = [1, 5, 80], strides = [1, 1, 1]} : vector<1x16x80xf32> to vector<1x5x80xf32>
    %239 = arith.addf %231, %238 : vector<1x5x80xf32>
    %c3_106 = arith.constant 3 : index
    %c1_107 = arith.constant 1 : index
    %c0_108 = arith.constant 0 : index
    %c0_109 = arith.constant 0 : index
    %240 = vector.load %arg4[%c3_106, %c1_107, %c0_108, %c0_109] : memref<5x2x84x80xbf16, #tpu.memory_space<vmem>>, vector<1x1x84x80xbf16>
    %241 = vector.shape_cast %240 : vector<1x1x84x80xbf16> to vector<84x80xbf16>
    %cst_110 = arith.constant dense<0.000000e+00> : vector<16x80xf32>
    %242 = tpu.matmul %179, %241, %cst_110 {dimension_numbers = #tpu.dot_dimension_numbers<[1], [0], [0], [1], [0, 0, 1, 1], [], []>} : vector<16x84xbf16>, vector<84x80xbf16>, vector<16x80xf32> -> vector<16x80xf32>
    %243 = vector.shape_cast %242 : vector<16x80xf32> to vector<1x16x80xf32>
    %244 = vector.extract_strided_slice %243 {offsets = [0, 8, 0], sizes = [1, 5, 80], strides = [1, 1, 1]} : vector<1x16x80xf32> to vector<1x5x80xf32>
    %245 = arith.addf %237, %244 : vector<1x5x80xf32>
    %246 = vector.extract_strided_slice %243 {offsets = [0, 2, 0], sizes = [1, 5, 80], strides = [1, 1, 1]} : vector<1x16x80xf32> to vector<1x5x80xf32>
    %247 = arith.addf %239, %246 : vector<1x5x80xf32>
    %c4_111 = arith.constant 4 : index
    %c1_112 = arith.constant 1 : index
    %c0_113 = arith.constant 0 : index
    %c0_114 = arith.constant 0 : index
    %248 = vector.load %arg4[%c4_111, %c1_112, %c0_113, %c0_114] : memref<5x2x84x80xbf16, #tpu.memory_space<vmem>>, vector<1x1x84x80xbf16>
    %249 = vector.shape_cast %248 : vector<1x1x84x80xbf16> to vector<84x80xbf16>
    %cst_115 = arith.constant dense<0.000000e+00> : vector<16x80xf32>
    %250 = tpu.matmul %179, %249, %cst_115 {dimension_numbers = #tpu.dot_dimension_numbers<[1], [0], [0], [1], [0, 0, 1, 1], [], []>} : vector<16x84xbf16>, vector<84x80xbf16>, vector<16x80xf32> -> vector<16x80xf32>
    %251 = vector.shape_cast %250 : vector<16x80xf32> to vector<1x16x80xf32>
    %252 = vector.extract_strided_slice %251 {offsets = [0, 2, 0], sizes = [1, 5, 80], strides = [1, 1, 1]} : vector<1x16x80xf32> to vector<1x5x80xf32>
    %253 = arith.addf %245, %252 : vector<1x5x80xf32>
    %254 = vector.extract_strided_slice %251 {offsets = [0, 9, 0], sizes = [1, 5, 80], strides = [1, 1, 1]} : vector<1x16x80xf32> to vector<1x5x80xf32>
    %255 = arith.addf %247, %254 : vector<1x5x80xf32>
    %256 = arith.maximumf %215, %253 : vector<1x5x80xf32>
    %257 = arith.maximumf %217, %255 : vector<1x5x80xf32>
    %258 = arith.maximumf %256, %257 : vector<1x5x80xf32>
    %c0_116 = arith.constant 0 : index
    %c0_117 = arith.constant 0 : index
    %259 = vector.load %arg5[%c0_116, %c0_117] : memref<1x80xf32, #tpu.memory_space<vmem>>, vector<1x80xf32>
    %260 = vector.shape_cast %259 : vector<1x80xf32> to vector<1x1x80xf32>
    %261 = vector.broadcast %260 : vector<1x1x80xf32> to vector<1x5x80xf32>
    %262 = arith.addf %258, %261 : vector<1x5x80xf32>
    %cst_118 = arith.constant 0.000000e+00 : f32
    %263 = vector.broadcast %cst_118 : f32 to vector<1x5x80xf32>
    %264 = arith.maximumf %262, %263 : vector<1x5x80xf32>
    %c0_119 = arith.constant 0 : index
    %c0_120 = arith.constant 0 : index
    %c0_121 = arith.constant 0 : index
    %265 = vector.load %arg14[%c0_119, %c0_120, %c0_121] : memref<1x5x80xf32, #tpu.memory_space<vmem>>, vector<1x5x80xf32>
    tpu.vector_store %arg14[%c0_119, %c0_120, %c0_121], %264 {strides = array<i32>} : memref<1x5x80xf32, #tpu.memory_space<vmem>>, vector<1x5x80xf32>,
    %c0_122 = arith.constant 0 : index
    %c0_123 = arith.constant 0 : index
    %c0_124 = arith.constant 0 : index
    %266 = vector.load %arg14[%c0_122, %c0_123, %c0_124] : memref<1x5x80xf32, #tpu.memory_space<vmem>>, vector<1x1x80xf32>
    %267 = vector.shape_cast %266 : vector<1x1x80xf32> to vector<1x80xf32>
    %268 = arith.truncf %267 : vector<1x80xf32> to vector<1x80xbf16>
    %c0_125 = arith.constant 0 : index
    %c0_126 = arith.constant 0 : index
    %c0_127 = arith.constant 0 : index
    %269 = vector.load %arg6[%c0_125, %c0_126, %c0_127] : memref<5x80x128xbf16, #tpu.memory_space<vmem>>, vector<1x80x128xbf16>
    %270 = vector.shape_cast %269 : vector<1x80x128xbf16> to vector<80x128xbf16>
    %cst_128 = arith.constant dense<0.000000e+00> : vector<1x128xf32>
    %271 = tpu.matmul %268, %270, %cst_128 {dimension_numbers = #tpu.dot_dimension_numbers<[1], [0], [0], [1], [0, 0, 1, 1], [], []>} : vector<1x80xbf16>, vector<80x128xbf16>, vector<1x128xf32> -> vector<1x128xf32>
    %c0_129 = arith.constant 0 : index
    %c1_130 = arith.constant 1 : index
    %c0_131 = arith.constant 0 : index
    %272 = vector.load %arg14[%c0_129, %c1_130, %c0_131] : memref<1x5x80xf32, #tpu.memory_space<vmem>>, vector<1x1x80xf32>
    %273 = vector.shape_cast %272 : vector<1x1x80xf32> to vector<1x80xf32>
    %274 = arith.truncf %273 : vector<1x80xf32> to vector<1x80xbf16>
    %c1_132 = arith.constant 1 : index
    %c0_133 = arith.constant 0 : index
    %c0_134 = arith.constant 0 : index
    %275 = vector.load %arg6[%c1_132, %c0_133, %c0_134] : memref<5x80x128xbf16, #tpu.memory_space<vmem>>, vector<1x80x128xbf16>
    %276 = vector.shape_cast %275 : vector<1x80x128xbf16> to vector<80x128xbf16>
    %cst_135 = arith.constant dense<0.000000e+00> : vector<1x128xf32>
    %277 = tpu.matmul %274, %276, %cst_135 {dimension_numbers = #tpu.dot_dimension_numbers<[1], [0], [0], [1], [0, 0, 1, 1], [], []>} : vector<1x80xbf16>, vector<80x128xbf16>, vector<1x128xf32> -> vector<1x128xf32>
    %278 = arith.addf %271, %277 : vector<1x128xf32>
    %c0_136 = arith.constant 0 : index
    %c2_137 = arith.constant 2 : index
    %c0_138 = arith.constant 0 : index
    %279 = vector.load %arg14[%c0_136, %c2_137, %c0_138] : memref<1x5x80xf32, #tpu.memory_space<vmem>>, vector<1x1x80xf32>
    %280 = vector.shape_cast %279 : vector<1x1x80xf32> to vector<1x80xf32>
    %281 = arith.truncf %280 : vector<1x80xf32> to vector<1x80xbf16>
    %c2_139 = arith.constant 2 : index
    %c0_140 = arith.constant 0 : index
    %c0_141 = arith.constant 0 : index
    %282 = vector.load %arg6[%c2_139, %c0_140, %c0_141] : memref<5x80x128xbf16, #tpu.memory_space<vmem>>, vector<1x80x128xbf16>
    %283 = vector.shape_cast %282 : vector<1x80x128xbf16> to vector<80x128xbf16>
    %cst_142 = arith.constant dense<0.000000e+00> : vector<1x128xf32>
    %284 = tpu.matmul %281, %283, %cst_142 {dimension_numbers = #tpu.dot_dimension_numbers<[1], [0], [0], [1], [0, 0, 1, 1], [], []>} : vector<1x80xbf16>, vector<80x128xbf16>, vector<1x128xf32> -> vector<1x128xf32>
    %285 = arith.addf %278, %284 : vector<1x128xf32>
    %c0_143 = arith.constant 0 : index
    %c3_144 = arith.constant 3 : index
    %c0_145 = arith.constant 0 : index
    %286 = vector.load %arg14[%c0_143, %c3_144, %c0_145] : memref<1x5x80xf32, #tpu.memory_space<vmem>>, vector<1x1x80xf32>
    %287 = vector.shape_cast %286 : vector<1x1x80xf32> to vector<1x80xf32>
    %288 = arith.truncf %287 : vector<1x80xf32> to vector<1x80xbf16>
    %c3_146 = arith.constant 3 : index
    %c0_147 = arith.constant 0 : index
    %c0_148 = arith.constant 0 : index
    %289 = vector.load %arg6[%c3_146, %c0_147, %c0_148] : memref<5x80x128xbf16, #tpu.memory_space<vmem>>, vector<1x80x128xbf16>
    %290 = vector.shape_cast %289 : vector<1x80x128xbf16> to vector<80x128xbf16>
    %cst_149 = arith.constant dense<0.000000e+00> : vector<1x128xf32>
    %291 = tpu.matmul %288, %290, %cst_149 {dimension_numbers = #tpu.dot_dimension_numbers<[1], [0], [0], [1], [0, 0, 1, 1], [], []>} : vector<1x80xbf16>, vector<80x128xbf16>, vector<1x128xf32> -> vector<1x128xf32>
    %292 = arith.addf %285, %291 : vector<1x128xf32>
    %c0_150 = arith.constant 0 : index
    %c4_151 = arith.constant 4 : index
    %c0_152 = arith.constant 0 : index
    %293 = vector.load %arg14[%c0_150, %c4_151, %c0_152] : memref<1x5x80xf32, #tpu.memory_space<vmem>>, vector<1x1x80xf32>
    %294 = vector.shape_cast %293 : vector<1x1x80xf32> to vector<1x80xf32>
    %295 = arith.truncf %294 : vector<1x80xf32> to vector<1x80xbf16>
    %c4_153 = arith.constant 4 : index
    %c0_154 = arith.constant 0 : index
    %c0_155 = arith.constant 0 : index
    %296 = vector.load %arg6[%c4_153, %c0_154, %c0_155] : memref<5x80x128xbf16, #tpu.memory_space<vmem>>, vector<1x80x128xbf16>
    %297 = vector.shape_cast %296 : vector<1x80x128xbf16> to vector<80x128xbf16>
    %cst_156 = arith.constant dense<0.000000e+00> : vector<1x128xf32>
    %298 = tpu.matmul %295, %297, %cst_156 {dimension_numbers = #tpu.dot_dimension_numbers<[1], [0], [0], [1], [0, 0, 1, 1], [], []>} : vector<1x80xbf16>, vector<80x128xbf16>, vector<1x128xf32> -> vector<1x128xf32>
    %299 = arith.addf %292, %298 : vector<1x128xf32>
    %c0_157 = arith.constant 0 : index
    %c0_158 = arith.constant 0 : index
    %300 = vector.load %arg7[%c0_157, %c0_158] : memref<1x128xf32, #tpu.memory_space<vmem>>, vector<1x128xf32>
    %301 = arith.addf %299, %300 : vector<1x128xf32>
    %cst_159 = arith.constant 0.000000e+00 : f32
    %302 = vector.broadcast %cst_159 : f32 to vector<1x128xf32>
    %303 = arith.maximumf %301, %302 : vector<1x128xf32>
    %304 = arith.truncf %303 : vector<1x128xf32> to vector<1x128xbf16>
    %c0_160 = arith.constant 0 : index
    %c0_161 = arith.constant 0 : index
    %305 = vector.load %arg8[%c0_160, %c0_161] : memref<128x128xbf16, #tpu.memory_space<vmem>>, vector<128x128xbf16>
    %cst_162 = arith.constant dense<0.000000e+00> : vector<1x128xf32>
    %306 = tpu.matmul %304, %305, %cst_162 {dimension_numbers = #tpu.dot_dimension_numbers<[1], [0], [0], [1], [0, 0, 1, 1], [], []>} : vector<1x128xbf16>, vector<128x128xbf16>, vector<1x128xf32> -> vector<1x128xf32>
    %c0_163 = arith.constant 0 : index
    %c0_164 = arith.constant 0 : index
    %307 = vector.load %arg9[%c0_163, %c0_164] : memref<1x128xf32, #tpu.memory_space<vmem>>, vector<1x128xf32>
    %308 = arith.addf %306, %307 : vector<1x128xf32>
    %cst_165 = arith.constant 0.000000e+00 : f32
    %309 = vector.broadcast %cst_165 : f32 to vector<1x128xf32>
    %310 = arith.maximumf %308, %309 : vector<1x128xf32>
    %311 = arith.truncf %310 : vector<1x128xf32> to vector<1x128xbf16>
    %c0_166 = arith.constant 0 : index
    %c0_167 = arith.constant 0 : index
    %312 = vector.load %arg10[%c0_166, %c0_167] : memref<128x128xbf16, #tpu.memory_space<vmem>>, vector<128x128xbf16>
    %cst_168 = arith.constant dense<0.000000e+00> : vector<1x128xf32>
    %313 = tpu.matmul %311, %312, %cst_168 {dimension_numbers = #tpu.dot_dimension_numbers<[1], [0], [0], [1], [0, 0, 1, 1], [], []>} : vector<1x128xbf16>, vector<128x128xbf16>, vector<1x128xf32> -> vector<1x128xf32>
    %c0_169 = arith.constant 0 : index
    %c0_170 = arith.constant 0 : index
    %314 = vector.load %arg11[%c0_169, %c0_170] : memref<1x128xf32, #tpu.memory_space<vmem>>, vector<1x128xf32>
    %315 = arith.addf %313, %314 : vector<1x128xf32>
    %316 = vector.shape_cast %315 : vector<1x128xf32> to vector<1x1x128xf32>
    %c0_171 = arith.constant 0 : index
    %c0_172 = arith.constant 0 : index
    %c0_173 = arith.constant 0 : index
    %317 = vector.load %arg12[%c0_171, %c0_172, %c0_173] : memref<1x1x128xf32, #tpu.memory_space<vmem>>, vector<1x1x128xf32>
    tpu.vector_store %arg12[%c0_171, %c0_172, %c0_173], %316 {strides = array<i32>} : memref<1x1x128xf32, #tpu.memory_space<vmem>>, vector<1x1x128xf32>,
    return
  }
  func.func @transform_0(%arg0: i32) -> (i32, i32, i32, i32, i32) {
    %c0_i32 = arith.constant 0 : i32
    %c0_i32_0 = arith.constant 0 : i32
    %c0_i32_1 = arith.constant 0 : i32
    %c0_i32_2 = arith.constant 0 : i32
    %c0_i32_3 = arith.constant 0 : i32
    return %arg0, %c0_i32, %c0_i32_0, %c0_i32_1, %c0_i32_2 : i32, i32, i32, i32, i32
  }
  func.func @transform_1(%arg0: i32) -> (i32, i32, i32, i32) {
    %c0_i32 = arith.constant 0 : i32
    %c0_i32_0 = arith.constant 0 : i32
    %c0_i32_1 = arith.constant 0 : i32
    %c0_i32_2 = arith.constant 0 : i32
    %c0_i32_3 = arith.constant 0 : i32
    return %c0_i32, %c0_i32_0, %c0_i32_1, %c0_i32_2 : i32, i32, i32, i32
  }
  func.func @transform_2(%arg0: i32) -> (i32, i32) {
    %c0_i32 = arith.constant 0 : i32
    %c0_i32_0 = arith.constant 0 : i32
    %c0_i32_1 = arith.constant 0 : i32
    return %c0_i32, %c0_i32_0 : i32, i32
  }
  func.func @transform_3(%arg0: i32) -> (i32, i32, i32, i32) {
    %c0_i32 = arith.constant 0 : i32
    %c0_i32_0 = arith.constant 0 : i32
    %c0_i32_1 = arith.constant 0 : i32
    %c0_i32_2 = arith.constant 0 : i32
    %c0_i32_3 = arith.constant 0 : i32
    return %c0_i32, %c0_i32_0, %c0_i32_1, %c0_i32_2 : i32, i32, i32, i32
  }
  func.func @transform_4(%arg0: i32) -> (i32, i32) {
    %c0_i32 = arith.constant 0 : i32
    %c0_i32_0 = arith.constant 0 : i32
    %c0_i32_1 = arith.constant 0 : i32
    return %c0_i32, %c0_i32_0 : i32, i32
  }
  func.func @transform_5(%arg0: i32) -> (i32, i32, i32) {
    %c0_i32 = arith.constant 0 : i32
    %c0_i32_0 = arith.constant 0 : i32
    %c0_i32_1 = arith.constant 0 : i32
    %c0_i32_2 = arith.constant 0 : i32
    return %c0_i32, %c0_i32_0, %c0_i32_1 : i32, i32, i32
  }
  func.func @transform_6(%arg0: i32) -> (i32, i32) {
    %c0_i32 = arith.constant 0 : i32
    %c0_i32_0 = arith.constant 0 : i32
    %c0_i32_1 = arith.constant 0 : i32
    return %c0_i32, %c0_i32_0 : i32, i32
  }
  func.func @transform_7(%arg0: i32) -> (i32, i32) {
    %c0_i32 = arith.constant 0 : i32
    %c0_i32_0 = arith.constant 0 : i32
    %c0_i32_1 = arith.constant 0 : i32
    return %c0_i32, %c0_i32_0 : i32, i32
  }
  func.func @transform_8(%arg0: i32) -> (i32, i32) {
    %c0_i32 = arith.constant 0 : i32
    %c0_i32_0 = arith.constant 0 : i32
    %c0_i32_1 = arith.constant 0 : i32
    return %c0_i32, %c0_i32_0 : i32, i32
  }
  func.func @transform_9(%arg0: i32) -> (i32, i32) {
    %c0_i32 = arith.constant 0 : i32
    %c0_i32_0 = arith.constant 0 : i32
    %c0_i32_1 = arith.constant 0 : i32
    return %c0_i32, %c0_i32_0 : i32, i32
  }
  func.func @transform_10(%arg0: i32) -> (i32, i32) {
    %c0_i32 = arith.constant 0 : i32
    %c0_i32_0 = arith.constant 0 : i32
    %c0_i32_1 = arith.constant 0 : i32
    return %c0_i32, %c0_i32_0 : i32, i32
  }
  func.func @transform_11(%arg0: i32) -> (i32, i32, i32) {
    %c0_i32 = arith.constant 0 : i32
    %c0_i32_0 = arith.constant 0 : i32
    %c0_i32_1 = arith.constant 0 : i32
    return %arg0, %c0_i32, %c0_i32_0 : i32, i32, i32
  }
}

</mosaic_0001>

<bundles_post_ra>
// kernel: tile.13
= control target key start
LH: loop header
LB: loop body
LE: loop exit
PB: predicated region body
PF: predicated region fallthrough
CT: control target
= control target key end

     0   :  { %s28_s0 = inlined_call_operand.vmem [shape: f32[6], index: 0, kind: input, shape index: {}]   ;;  %s29_s1 = inlined_call_operand.vmem [shape: f32[14,6], index: 1, kind: output, shape index: {}]  }
   0x1   :  { %v4_v0 = vld [vmem:[%s28_s0] ss:$0 sm:$0xff] }
   0x2   :  { %5 = vst [vmem:[%s29_s1] sm:$0xff] %v4_v0  ;;  %8 = vst [vmem:[%s29_s1 + $0x8] sm:$0xff] %v4_v0 }

// kernel: tile.14
= control target key start
LH: loop header
LB: loop body
LE: loop exit
PB: predicated region body
PF: predicated region fallthrough
CT: control target
= control target key end

     0   :  { %s115_s10 = smov 78   ;;  %s116_s11 = smov 66   ;;  %vm3_vm0 = vcmask 48128   ;;  %vm9_vm1 = vcmask 687728   ;;  %vm15_vm2 = vcmask 638528   ;;  %vm21_vm3 = vcmask 589328   ;;  %s183_s0 = inlined_call_operand.vmem [shape: f32[14,6], index: 0, kind: input, shape index: {}]   ;;  %s184_s1 = inlined_call_operand.vmem [shape: f32[1,84], index: 1, kind: output, shape index: {}]  }
   0x1   :  { %v89_v0 = vld [vmem:[%s183_s0 + $0xd] sm:$0x1]   ;;  %v91_v1 = vld [vmem:[%s183_s0 + $0xb] sm:$0x1]   ;;  %v90_v2 = vld [vmem:[%s183_s0 + $0xc] sm:$0x1]  }
   0x2   :  { %7 = vrot.lane.b32.xlu0 %v89_v0, %s115_s10  ;;  %19 = vrot.lane.b32.xlu1 %v91_v1, %s116_s11  ;;  %v92_v3 = vld [vmem:[%s183_s0 + $0xa] sm:$0x1]   ;;  %s117_s16 = smov 72   ;;  %s118_s17 = smov 60   ;;  %v93_v4 = vld [vmem:[%s183_s0 + $0x9] sm:$0x1]  }
   0x3   :  { %v94_v5 = vld [vmem:[%s183_s0 + $0x8] sm:$0x1]   ;;  %v2_v6 = vld [vmem:[%s183_s0] sm:$0x1]   ;;  %s119_s24 = smov 54   ;;  %s120_s25 = smov 48  }
   0x4   :  { %4 = vst.msk [vmem:[#allocation0] sm:$0x1] %vm3_vm0, %v2_v6   ;;  %v95_v7 = vld [vmem:[%s183_s0 + $0x7] sm:$0x1]   ;;  %v96_v8 = vld [vmem:[%s183_s0 + $0x6] sm:$0x1]  }
   0x5   :  { %s121_s30 = smov 42   ;;  %s122_s2 = smov 36   ;;  %v97_v9 = vld [vmem:[%s183_s0 + $0x5] sm:$0x1]   ;;  %v98_v10 = vld [vmem:[%s183_s0 + $0x4] sm:$0x1]  }
   0x6   :  { %13 = vrot.lane.b32.xlu0 %v90_v2, %s117_s16  ;;  %25 = vrot.lane.b32.xlu1 %v92_v3, %s118_s17  ;;  %s123_s7 = smov 30   ;;  %s124_s8 = smov 24   ;;  %v99_v11 = vld [vmem:[%s183_s0 + $0x3] sm:$0x1]   ;;  %v100_v12 = vld [vmem:[%s183_s0 + $0x2] sm:$0x1]  }
   0x7   :  { %s125_s13 = smov 18   ;;  %s126_s14 = smov 12   ;;  %v101_v13 = vld [vmem:[%s183_s0 + $0x1] sm:$0x1]   ;;  %vm27_vm4 = vcmask 540128   ;;  %vm33_vm5 = vcmask 490928  }
   0x8   :  { %s127_s0 = smov 6   ;;  %vm39_vm6 = vcmask 441728   ;;  %vm45_vm7 = vcmask 392528   ;;  %vm51_vm8 = vcmask 343328   ;;  %vm57_vm9 = vcmask 294128  }
   0x9   :  { %vm63_vm10 = vcmask 244928   ;;  %vm69_vm11 = vcmask 195728   ;;  %vm75_vm12 = vcmask 146528   ;;  %vm81_vm13 = vcmask 97328  }
   0xa   :  { %31 = vrot.lane.b32.xlu0 %v93_v4, %s119_s24  ;;  %37 = vrot.lane.b32.xlu1 %v94_v5, %s120_s25 }
   0xe   :  { %43 = vrot.lane.b32.xlu0 %v95_v7, %s121_s30  ;;  %49 = vrot.lane.b32.xlu1 %v96_v8, %s122_s2 }
  0x12   :  { %55 = vrot.lane.b32.xlu0 %v97_v9, %s123_s7  ;;  %61 = vrot.lane.b32.xlu1 %v98_v10, %s124_s8 }
  0x16   :  { %67 = vrot.lane.b32.xlu0 %v99_v11, %s125_s13  ;;  %73 = vrot.lane.b32.xlu1 %v100_v12, %s126_s14 }
  0x1a   :  { %79 = vrot.lane.b32.xlu0 %v101_v13, %s127_s0 }
  0x74   :  { %v8_v14 = vpop.permute.xlu0 %7   ;;  %v20_v15 = vpop.permute.xlu1 %19  }
  0x75   :  { %10 = vst.msk [vmem:[#allocation0] sm:$0x1] %vm9_vm1, %v8_v14  }
  0x78   :  { %v14_v16 = vpop.permute.xlu0 %13   ;;  %v26_v17 = vpop.permute.xlu1 %25  }
  0x79   :  { %16 = vst.msk [vmem:[#allocation0] sm:$0x1] %vm15_vm2, %v14_v16  }
  0x7a   :  { %22 = vst.msk [vmem:[#allocation0] sm:$0x1] %vm21_vm3, %v20_v15  }
  0x7b   :  { %28 = vst.msk [vmem:[#allocation0] sm:$0x1] %vm27_vm4, %v26_v17  }
  0x7c   :  { %v32_v18 = vpop.permute.xlu0 %31   ;;  %v38_v19 = vpop.permute.xlu1 %37  }
  0x7d   :  { %34 = vst.msk [vmem:[#allocation0] sm:$0x1] %vm33_vm5, %v32_v18  }
  0x7e   :  { %40 = vst.msk [vmem:[#allocation0] sm:$0x1] %vm39_vm6, %v38_v19  }
  0x80   :  { %v44_v20 = vpop.permute.xlu0 %43   ;;  %v50_v21 = vpop.permute.xlu1 %49  }
  0x81   :  { %46 = vst.msk [vmem:[#allocation0] sm:$0x1] %vm45_vm7, %v44_v20  }
  0x82   :  { %52 = vst.msk [vmem:[#allocation0] sm:$0x1] %vm51_vm8, %v50_v21  }
  0x84   :  { %v56_v22 = vpop.permute.xlu0 %55   ;;  %v62_v23 = vpop.permute.xlu1 %61  }
  0x85   :  { %58 = vst.msk [vmem:[#allocation0] sm:$0x1] %vm57_vm9, %v56_v22  }
  0x86   :  { %64 = vst.msk [vmem:[#allocation0] sm:$0x1] %vm63_vm10, %v62_v23  }
  0x88   :  { %v68_v24 = vpop.permute.xlu0 %67   ;;  %v74_v25 = vpop.permute.xlu1 %73  }
  0x89   :  { %70 = vst.msk [vmem:[#allocation0] sm:$0x1] %vm69_vm11, %v68_v24  }
  0x8a   :  { %76 = vst.msk [vmem:[#allocation0] sm:$0x1] %vm75_vm12, %v74_v25  }
  0x8c   :  { %v80_v26 = vpop.permute.xlu0 %79  }
  0x8d   :  { %82 = vst.msk [vmem:[#allocation0] sm:$0x1] %vm81_vm13, %v80_v26  }
  0x94   :  { %v86_v27 = vld [vmem:[#allocation0] sm:$0x1] }
  0x95   :  { %88 = vst [vmem:[%s184_s1] sm:$0x1] %v86_v27 }

// kernel: tile.18
= control target key start
LH: loop header
LB: loop body
LE: loop exit
PB: predicated region body
PF: predicated region fallthrough
CT: control target
= control target key end

     0   :  { %s22_s0 = inlined_call_operand.vmem [shape: f32[16], index: 0, kind: input, shape index: {}]   ;;  %s23_s1 = inlined_call_operand.vmem [shape: f32[5,16], index: 1, kind: output, shape index: {}]  }
   0x1   :  { %v4_v0 = vld [vmem:[%s22_s0] ss:$0 sm:$0xff] }
   0x2   :  { %5 = vst [vmem:[%s23_s1] sm:$0xff] %v4_v0 }

// kernel: tile.19
= control target key start
LH: loop header
LB: loop body
LE: loop exit
PB: predicated region body
PF: predicated region fallthrough
CT: control target
= control target key end

     0   :  { %s43_s10 = smov 64   ;;  %s44_s11 = smov 32   ;;  %vm3_vm0 = vcmask 130048   ;;  %vm9_vm1 = vcmask 654848   ;;  %vm15_vm2 = vcmask 523648   ;;  %vm21_vm3 = vcmask 392448   ;;  %s75_s0 = inlined_call_operand.vmem [shape: f32[5,16], index: 0, kind: input, shape index: {}]   ;;  %s76_s1 = inlined_call_operand.vmem [shape: f32[1,80], index: 1, kind: output, shape index: {}]  }
   0x1   :  { %v35_v0 = vld [vmem:[%s75_s0 + $0x4] sm:$0x1]   ;;  %v37_v1 = vld [vmem:[%s75_s0 + $0x2] sm:$0x1]   ;;  %v36_v2 = vld [vmem:[%s75_s0 + $0x3] sm:$0x1]  }
   0x2   :  { %7 = vrot.lane.b32.xlu0 %v35_v0, %s43_s10  ;;  %19 = vrot.lane.b32.xlu1 %v37_v1, %s44_s11  ;;  %v38_v3 = vld [vmem:[%s75_s0 + $0x1] sm:$0x1]   ;;  %v2_v4 = vld [vmem:[%s75_s0] sm:$0x1]   ;;  %s45_s0 = smov 48   ;;  %s46_s18 = smov 16  }
   0x3   :  { %4 = vst.msk [vmem:[#allocation0] sm:$0x1] %vm3_vm0, %v2_v4   ;;  %vm27_vm4 = vcmask 261248  }
   0x6   :  { %13 = vrot.lane.b32.xlu0 %v36_v2, %s45_s0  ;;  %25 = vrot.lane.b32.xlu1 %v38_v3, %s46_s18 }
  0x74   :  { %v8_v5 = vpop.permute.xlu0 %7   ;;  %v20_v6 = vpop.permute.xlu1 %19  }
  0x75   :  { %10 = vst.msk [vmem:[#allocation0] sm:$0x1] %vm9_vm1, %v8_v5  }
  0x78   :  { %v14_v7 = vpop.permute.xlu0 %13   ;;  %v26_v8 = vpop.permute.xlu1 %25  }
  0x79   :  { %16 = vst.msk [vmem:[#allocation0] sm:$0x1] %vm15_vm2, %v14_v7  }
  0x7a   :  { %22 = vst.msk [vmem:[#allocation0] sm:$0x1] %vm21_vm3, %v20_v6  }
  0x7b   :  { %28 = vst.msk [vmem:[#allocation0] sm:$0x1] %vm27_vm4, %v26_v8  }
  0x82   :  { %v32_v9 = vld [vmem:[#allocation0] sm:$0x1] }
  0x83   :  { %34 = vst [vmem:[%s76_s1] sm:$0x1] %v32_v9 }

// kernel: convnet_forward.1
= control target key start
LH: loop header
LB: loop body
LE: loop exit
PB: predicated region body
PF: predicated region fallthrough
CT: control target
= control target key end

     0   :  { %16 = vsyncpa [#allocation5], 0  ;;  %s5448_s0 = inlined_call_operand.vmem [shape: bf16[2,1,4,8,96], index: 0, kind: input, shape index: {}]   ;;  %s5449_s1 = inlined_call_operand.vmem [shape: bf16[5,2,96,84], index: 1, kind: input, shape index: {}]   ;;  %s5450_s2 = inlined_call_operand.vmem [shape: f32[1,84], index: 2, kind: input, shape index: {}]   ;;  %s5451_s3 = inlined_call_operand.vmem [shape: bf16[5,2,84,80], index: 3, kind: input, shape index: {}]   ;;  %s5452_s4 = inlined_call_operand.vmem [shape: f32[1,80], index: 4, kind: input, shape index: {}]   ;;  %s5453_s5 = inlined_call_operand.vmem [shape: bf16[5,80,128], index: 5, kind: input, shape index: {}]   ;;  %s5454_s6 = inlined_call_operand.vmem [shape: f32[1,128], index: 6, kind: input, shape index: {}]   ;;  %s5455_s7 = inlined_call_operand.vmem [shape: bf16[128,128], index: 7, kind: input, shape index: {}]   ;;  %s5456_s8 = inlined_call_operand.vmem [shape: f32[1,128], index: 8, kind: input, shape index: {}]   ;;  %s5457_s9 = inlined_call_operand.vmem [shape: bf16[128,128], index: 9, kind: input, shape index: {}]   ;;  %s5458_s10 = inlined_call_operand.vmem [shape: f32[1,128], index: 10, kind: input, shape index: {}]   ;;  %s5459_s11 = inlined_call_operand.hbm [shape: f32[2,1,128], index: 11, kind: output, shape index: {}]  }
   0x1   :  { %18 = vsyncpa [#allocation5 + $0x1], 0  ;;  %s4630_s17 = smov 0   ;;  %s4632_s18 = smov 0  }
   0x2   :  { %s4634_s19 = smov 0   ;;  %s4636_s20 = smov 0  }
   0x3 LB: > { %s4651_s21 = sadd.s32 4294967295, %s4565_s20   ;;  %s3213_s22 = sadd.s32 4294967294, %s4565_s20   ;;  %s4565_s20 = sphi %s4636_s20, %s5467_s20   ;;  %s4561_s19 = sphi %s4634_s19, %s5466_s19   ;;  %s4557_s18 = sphi %s4632_s18, %s5465_s18   ;;  %s4553_s17 = sphi %s4630_s17, %s5464_s17  }
   0x4   : > { %s4655_s23 = sadd.s32 1, %s4565_s20   ;;  %s267_s24 = sadd.s32 1, %s4561_s19 }
   0x5   : > { %s264_s25 = ssub.s32 %s4565_s20, %s4655_s23  ;;  %p277_p0 = scmp.ne.s32.totalorder %s4561_s19, %s4557_s18 }
   0x6   : > { %p265_p1 = scmp.eq.s32.totalorder %s264_s25, 0  ;;  %p278_p2 = scmp.eq.s32.totalorder %s4651_s21, 1 }
   0x7   : > { %p283_p3 = scmp.ne.s32.totalorder %s4557_s18, %s4553_s17  ;;  %p284_p4 = scmp.eq.s32.totalorder %s3213_s22, 1 }
   0x8   : > { %s4666_s26 = scalar_select %p265_p1, %s4561_s19, %s267_s24  }
   0x9   : > { %p4668_p5 = por %p278_p2, %p277_p0  ;;  %p4672_p6 = por %p284_p4, %p283_p3 }
   0xa   : > { %5460 = sst [smem:[#allocation7_spill]] %s4666_s26  ;;  %p3216_p7 = scmp.ge.s32.totalorder %s4565_s20, 1 }
   0xb   : > { %p340_p8 = scmp.lt.s32.totalorder %s4565_s20, 3 }
   0xd   : > { %p341_p9 = pnand %p3216_p7, %p340_p8 }
   0xe   : > { %v4340_v0 = vld [vmem:[%s5449_s1] sm:$0xff] (!%p341_p9)   ;;  %p379_p10 = scmp.lt.s32.totalorder (!%p341_p9), %s4651_s21, 1  ;;  %v4342_v2 = vld [vmem:[%s5449_s1 + $0x8] sm:$0xff] (!%p341_p9)   ;;  %v4344_v4 = vld [vmem:[%s5449_s1 + $0x10] sm:$0xff] (!%p341_p9)   ;;  %vm447_vm0 = vcmask (!%p341_p9), 785408   ;;  %vm1504_vm1 = vcmask (!%p341_p9), 680960  }
   0xf   : > { %344 = sbr.rel (%p341_p9) target bundleno = 1415 (0x587), region = 64  ;;  %v4341_v1 = vld [vmem:[%s5449_s1 + $0x60] sm:$0xff] (!%p341_p9)   ;;  %3869 = vmatprep.subr.bf16.mxu0 (!%p341_p9), %v4340_v0  ;;  %v4343_v3 = vld [vmem:[%s5449_s1 + $0x68] sm:$0xff] (!%p341_p9)   ;;  %v4345_v5 = vld [vmem:[%s5449_s1 + $0x70] sm:$0xff] (!%p341_p9)   ;;  %vm1557_vm2 = vcmask (!%p341_p9), 1041408   ;;  %vm4568_vm3 = vmmov (!%p341_p9), 0  }
  0x10   : > { %3885 = vmatprep.subr.bf16.mxu1 (!%p341_p9), %v4341_v1  ;;  %3870 = vmatpush3.bf16.msra.mxu0 (!%p341_p9), %v4340_v0  ;;  %v4346_v6 = vld [vmem:[%s5449_s1 + $0x18] sm:$0xff] (!%p341_p9)   ;;  %v4348_v8 = vld [vmem:[%s5449_s1 + $0x20] sm:$0xff] (!%p341_p9)   ;;  %v4350_v11 = vld [vmem:[%s5449_s1 + $0x28] sm:$0xff] (!%p341_p9)   ;;  %v4567_v0 = vmov (!%p341_p9), 0.0   ;;  %vm1491_vm4 = vcmask (!%p341_p9), 686080   ;;  %vm1553_vm5 = vcmask (!%p341_p9), 687104  }
  0x11   : > { %3886 = vmatpush3.bf16.msra.mxu1 (!%p341_p9), %v4341_v1  ;;  %3871 = vmatprep.subr.bf16.mxu0 (!%p341_p9), %v4342_v2  ;;  %v4347_v7 = vld [vmem:[%s5449_s1 + $0x78] sm:$0xff] (!%p341_p9)   ;;  %v4349_v10 = vld [vmem:[%s5449_s1 + $0x80] sm:$0xff] (!%p341_p9)   ;;  %v4351_v12 = vld [vmem:[%s5449_s1 + $0x88] sm:$0xff] (!%p341_p9)   ;;  %1505 = vst.msk [vmem:[#allocation2 + $0xe] sm:$0x3] (!%p341_p9), %vm1504_vm1, %v4567_v0  ;;  %vm1693_vm6 = vcmask (!%p341_p9), 1040384  }
  0x12   : > { %3887 = vmatprep.subr.bf16.mxu1 (!%p341_p9), %v4343_v3  ;;  %v4354_v13 = vld [vmem:[%s5449_s1 + $0xc0] sm:$0xff] (!%p341_p9)   ;;  %v4356_v16 = vld [vmem:[%s5449_s1 + $0xc8] sm:$0xff] (!%p341_p9)   ;;  %v4358_v18 = vld [vmem:[%s5449_s1 + $0xd0] sm:$0xff] (!%p341_p9)   ;;  %vm2493_vm7 = vcmask (!%p341_p9), 651264   ;;  %vm2550_vm8 = vcmask (!%p341_p9), 654336   ;;  %s377_s22 = sand.u32 (!%p341_p9), 1, %s4557_s18  }
  0x13   : > { %v4355_v14 = vld [vmem:[%s5449_s1 + $0x120] sm:$0xff] (!%p341_p9)   ;;  %v4357_v17 = vld [vmem:[%s5449_s1 + $0x128] sm:$0xff] (!%p341_p9)   ;;  %v4359_v19 = vld [vmem:[%s5449_s1 + $0x130] sm:$0xff] (!%p341_p9)   ;;  %s3667_s29 = sshll.u32 (!%p341_p9), %s4651_s21, 4  ;;  %s378_s30 = scalar_lea.vmem (!%p341_p9), [#allocation4], %s377_s22 }
  0x14   : > { %3872 = vmatpush3.bf16.msra.mxu0 (!%p341_p9), %v4342_v2  ;;  %v4360_v20 = vld [vmem:[%s5449_s1 + $0xd8] sm:$0xff] (!%p341_p9)   ;;  %v4362_v22 = vld [vmem:[%s5449_s1 + $0xe0] sm:$0xff] (!%p341_p9)   ;;  %v4364_v24 = vld [vmem:[%s5449_s1 + $0xe8] sm:$0xff] (!%p341_p9)   ;;  %s3158_s12 = sshll.u32 (!%p341_p9), %s378_s30, 4  ;;  %s3146_s15 = scalar_lea.sflag (!%p341_p9), [#allocation5], %s377_s22  ;;  %s5408_s12 = int_to_ptr.vmem [resolvable:$true] %s3158_s12 }
  0x15   : > { %3888 = vmatpush3.bf16.msra.mxu1 (!%p341_p9), %v4343_v3  ;;  %3873 = vmatprep.subr.bf16.mxu0 (!%p341_p9), %v4344_v4  ;;  %v4361_v21 = vld [vmem:[%s5449_s1 + $0x138] sm:$0xff] (!%p341_p9)   ;;  %v4363_v23 = vld [vmem:[%s5449_s1 + $0x140] sm:$0xff] (!%p341_p9)   ;;  %v4365_v25 = vld [vmem:[%s5449_s1 + $0x148] sm:$0xff] (!%p341_p9)  }
  0x16   : > { %s380_s16 = scalar_select %p379_p10, %s4651_s21, 1  ;;  %3889 = vmatprep.subr.bf16.mxu1 %v4345_v5  ;;  %v4366_v26 = vld [vmem:[%s5449_s1 + $0x180] sm:$0xff]   ;;  %v4367_v27 = vld [vmem:[%s5449_s1 + $0x30] sm:$0xff]   ;;  %v4368_v28 = vld [vmem:[%s5449_s1 + $0x188] sm:$0xff]  }
  0x17   : > { %v4369_v29 = vld [vmem:[%s5449_s1 + $0x38] sm:$0xff]   ;;  %v4370_v30 = vld [vmem:[%s5449_s1 + $0x190] sm:$0xff]   ;;  %v4371_v31 = vld [vmem:[%s5449_s1 + $0x40] sm:$0xff]   ;;  %s4503_s21 = scalar_lea.vmem %s5408_s12, 16 }
  0x18   : > { %s3670_s13 = sshll.u32 %s380_s16, 4  ;;  %3874 = vmatpush3.bf16.msra.mxu0 %v4344_v4  ;;  %v4372_v32 = vld [vmem:[%s5449_s1 + $0x198] sm:$0xff]   ;;  %v4373_v33 = vld [vmem:[%s5449_s1 + $0x48] sm:$0xff]   ;;  %v4374_v34 = vld [vmem:[%s5449_s1 + $0x1a0] sm:$0xff]   ;;  %p4504_p11 = scmp.ne.s32.totalorder %s5408_s12, %s4503_s21 }
  0x19   : > { %s383_s26 = scalar_lea.vmem %s5448_s0, %s3670_s13  ;;  %3890 = vmatpush3.bf16.msra.mxu1 %v4345_v5  ;;  %3875 = vmatprep.subr.bf16.mxu0 %v4346_v6  ;;  %v4375_v35 = vld [vmem:[%s5449_s1 + $0x50] sm:$0xff]   ;;  %v4376_v36 = vld [vmem:[%s5449_s1 + $0x1a8] sm:$0xff]   ;;  %v4377_v37 = vld [vmem:[%s5449_s1 + $0x58] sm:$0xff]   ;;  %s5406_s13 = scalar_lea.hbm %s5459_s11, %s3667_s29 }
  0x1a   : > { %v4710_v9 = vld [vmem:[%s383_s26] sm:$0xff]   ;;  %3891 = vmatprep.subr.bf16.mxu1 %v4347_v7  ;;  %v4731_v15 = vld [vmem:[%s383_s26 + $0x8] sm:$0xff]   ;;  %v4378_v38 = vld [vmem:[%s5449_s1 + $0x90] sm:$0xff]   ;;  %p4505_p12 = pnand %p4504_p11, %p4668_p5  ;;  %s4569_s26 = smov [#allocation4]  }
  0x1b   : > { %3881 = vmatprep.mubr.msk.bf16.mxu0 %vm447_vm0, %v4710_v9  ;;  %3897 = vmatprep.mubr.msk.bf16.mxu1 %vm447_vm0, %v4710_v9  ;;  %v4379_v39 = vld [vmem:[%s5449_s1 + $0xf0] sm:$0xff]   ;;  %v4380_v40 = vld [vmem:[%s5449_s1 + $0x98] sm:$0xff]   ;;  %v4382_v42 = vld [vmem:[%s5449_s1 + $0xa0] sm:$0xff]   ;;  %s4507_s24 = sshll.u32 %s4569_s26, 4  ;;  %s4508_s24 = int_to_ptr.vmem [resolvable:$false] %s4507_s24 }
  0x1c   : > { %3876 = vmatpush3.bf16.msra.mxu0 %v4346_v6  ;;  %v4381_v41 = vld [vmem:[%s5449_s1 + $0xf8] sm:$0xff]   ;;  %v4383_v43 = vld [vmem:[%s5449_s1 + $0x100] sm:$0xff]   ;;  %v4384_v44 = vld [vmem:[%s5449_s1 + $0xa8] sm:$0xff]   ;;  %p4506_p13 = pneg %p4505_p12  ;;  %s4509_s25 = scalar_lea.vmem %s4508_s24, 32 }
  0x1d   : > { %3892 = vmatpush3.bf16.msra.mxu1 %v4347_v7  ;;  %3877 = vmatprep.subr.bf16.mxu0 %v4348_v8  ;;  %v4385_v45 = vld [vmem:[%s5449_s1 + $0x108] sm:$0xff]   ;;  %v4386_v46 = vld [vmem:[%s5449_s1 + $0xb0] sm:$0xff]   ;;  %v4388_v48 = vld [vmem:[%s5449_s1 + $0xb8] sm:$0xff]   ;;  %p4510_p0 = scmp.lt.s32.totalorder %s5408_s12, %s4508_s24  ;;  %p4511_p1 = scmp.lt.s32.totalorder %s4509_s25, %s4503_s21 }
  0x1e   : > { %3893 = vmatprep.subr.bf16.mxu1 %v4349_v10  ;;  %v4387_v47 = vld [vmem:[%s5449_s1 + $0x110] sm:$0xff]   ;;  %v4389_v49 = vld [vmem:[%s5449_s1 + $0x118] sm:$0xff]   ;;  %v4394_v54 = vld [vmem:[%s5449_s1 + $0x160] sm:$0xff]  }
  0x1f   : > { %v4390_v50 = vld [vmem:[%s5449_s1 + $0x150] sm:$0xff]   ;;  %v4392_v52 = vld [vmem:[%s5449_s1 + $0x158] sm:$0xff]   ;;  %v4395_v55 = vld [vmem:[%s5449_s1 + $0x1c0] sm:$0xff]   ;;  %p4512_p2 = por %p4511_p1, %p4510_p0 }
  0x20   : > { %3878 = vmatpush3.bf16.msra.mxu0 %v4348_v8  ;;  %v4391_v51 = vld [vmem:[%s5449_s1 + $0x1b0] sm:$0xff]   ;;  %v4393_v53 = vld [vmem:[%s5449_s1 + $0x1b8] sm:$0xff]   ;;  %v4396_v56 = vld [vmem:[%s5449_s1 + $0x168] sm:$0xff]  }
  0x21   : > { %3894 = vmatpush3.bf16.msra.mxu1 %v4349_v10  ;;  %3879 = vmatprep.subr.bf16.mxu0 %v4350_v11  ;;  %v4397_v57 = vld [vmem:[%s5449_s1 + $0x1c8] sm:$0xff]   ;;  %v4398_v58 = vld [vmem:[%s5449_s1 + $0x170] sm:$0xff]   ;;  %v4400_v60 = vld [vmem:[%s5449_s1 + $0x178] sm:$0xff]   ;;  %p4513_p3 = pnand %p4512_p2, %p4506_p13 }
  0x22   : > { %3895 = vmatprep.subr.bf16.mxu1 %v4351_v12  ;;  %v4399_v59 = vld [vmem:[%s5449_s1 + $0x1d0] sm:$0xff]   ;;  %v4401_v61 = vld [vmem:[%s5449_s1 + $0x1d8] sm:$0xff]   ;;  %v4402_v62 = vld [vmem:[%s5451_s3] sm:$0xff]  }
  0x23   : > { %v4403_v63 = vld [vmem:[%s5451_s3 + $0x58] sm:$0xff]   ;;  %v4404_v1 = vld [vmem:[%s5451_s3 + $0x8] sm:$0xff]   ;;  %v4405_v2 = vld [vmem:[%s5451_s3 + $0x60] sm:$0xff]  }
  0x24   : > { %3880 = vmatpush3.bf16.msra.mxu0 %v4350_v11  ;;  %v4406_v3 = vld [vmem:[%s5451_s3 + $0x10] sm:$0xff]   ;;  %v4407_v4 = vld [vmem:[%s5451_s3 + $0x68] sm:$0xff]   ;;  %v4408_v5 = vld [vmem:[%s5451_s3 + $0x18] sm:$0xff]  }
  0x25   : > { %3896 = vmatpush3.bf16.msra.mxu1 %v4351_v12  ;;  %3901 = vmatprep.subr.bf16.mxu0 %v4354_v13  ;;  %v4409_v6 = vld [vmem:[%s5451_s3 + $0x70] sm:$0xff]   ;;  %v4410_v7 = vld [vmem:[%s5451_s3 + $0x20] sm:$0xff]   ;;  %v4411_v8 = vld [vmem:[%s5451_s3 + $0x78] sm:$0xff]  }
  0x26   : > { %3917 = vmatprep.subr.bf16.mxu1 %v4355_v14  ;;  %v4413_v10 = vld [vmem:[%s5451_s3 + $0x80] ss:$0 sps:$4 sm:$0x33]  }
  0x27   : > { %3882 = vmatmul.mubr.msk.bf16.vlgmr.msra.gmra.mrb[0].mxu0 %vm447_vm0, %v4731_v15  ;;  %v1648_v12 = vsel %vm1557_vm2, %v4413_v10, 0 }
  0x28   : > { %3898 = vmatmul.mubr.msk.bf16.vlgmr.msra.gmra.mrb[0].mxu1 %vm447_vm0, %v4731_v15  ;;  %3902 = vmatpush3.bf16.msra.mxu0 %v4354_v13 }
  0x29   : > { %3918 = vmatpush3.bf16.msra.mxu1 %v4355_v14  ;;  %3903 = vmatprep.subr.bf16.mxu0 %v4356_v16 }
  0x2a   : > { %3919 = vmatprep.subr.bf16.mxu1 %v4357_v17  ;;  %3913 = vmatprep.mubr.msk.bf16.mxu0 %vm447_vm0, %v4710_v9 }
  0x2b   : > { %3929 = vmatprep.mubr.msk.bf16.mxu1 %vm447_vm0, %v4710_v9 }
  0x2c   : > { %3904 = vmatpush3.bf16.msra.mxu0 %v4356_v16 }
  0x2d   : > { %3920 = vmatpush3.bf16.msra.mxu1 %v4357_v17  ;;  %3905 = vmatprep.subr.bf16.mxu0 %v4358_v18 }
  0x2e   : > { %3921 = vmatprep.subr.bf16.mxu1 %v4359_v19 }
  0x30   : > { %3906 = vmatpush3.bf16.msra.mxu0 %v4358_v18 }
  0x31   : > { %3922 = vmatpush3.bf16.msra.mxu1 %v4359_v19  ;;  %3907 = vmatprep.subr.bf16.mxu0 %v4360_v20 }
  0x32   : > { %3923 = vmatprep.subr.bf16.mxu1 %v4361_v21 }
  0x34   : > { %3908 = vmatpush3.bf16.msra.mxu0 %v4360_v20 }
  0x35   : > { %3924 = vmatpush3.bf16.msra.mxu1 %v4361_v21  ;;  %3909 = vmatprep.subr.bf16.mxu0 %v4362_v22 }
  0x36   : > { %3925 = vmatprep.subr.bf16.mxu1 %v4363_v23 }
  0x38   : > { %3910 = vmatpush3.bf16.msra.mxu0 %v4362_v22 }
  0x39   : > { %3926 = vmatpush3.bf16.msra.mxu1 %v4363_v23  ;;  %3911 = vmatprep.subr.bf16.mxu0 %v4364_v24 }
  0x3a   : > { %3927 = vmatprep.subr.bf16.mxu1 %v4365_v25 }
  0x3c   : > { %3912 = vmatpush3.bf16.msra.mxu0 %v4364_v24 }
  0x3d   : > { %3928 = vmatpush3.bf16.msra.mxu1 %v4365_v25  ;;  %3933 = vmatprep.subr.bf16.mxu0 %v4366_v26 }
  0x3e   : > { %3949 = vmatprep.subr.bf16.mxu1 %v4367_v27 }
  0x3f   : > { %3914 = vmatmul.mubr.msk.bf16.vlgmr.msra.gmra.mrb[4].mxu0 %vm447_vm0, %v4731_v15 }
  0x40   : > { %3930 = vmatmul.mubr.msk.bf16.vlgmr.msra.gmra.mrb[4].mxu1 %vm447_vm0, %v4731_v15  ;;  %3934 = vmatpush3.bf16.msra.mxu0 %v4366_v26 }
  0x41   : > { %3950 = vmatpush3.bf16.msra.mxu1 %v4367_v27  ;;  %3935 = vmatprep.subr.bf16.mxu0 %v4368_v28 }
  0x42   : > { %3951 = vmatprep.subr.bf16.mxu1 %v4369_v29  ;;  %3945 = vmatprep.mubr.msk.bf16.mxu0 %vm447_vm0, %v4710_v9 }
  0x43   : > { %3961 = vmatprep.mubr.msk.bf16.mxu1 %vm447_vm0, %v4710_v9 }
  0x44   : > { %3936 = vmatpush3.bf16.msra.mxu0 %v4368_v28 }
  0x45   : > { %3952 = vmatpush3.bf16.msra.mxu1 %v4369_v29  ;;  %3937 = vmatprep.subr.bf16.mxu0 %v4370_v30 }
  0x46   : > { %3953 = vmatprep.subr.bf16.mxu1 %v4371_v31 }
  0x48   : > { %3938 = vmatpush3.bf16.msra.mxu0 %v4370_v30 }
  0x49   : > { %3954 = vmatpush3.bf16.msra.mxu1 %v4371_v31  ;;  %3939 = vmatprep.subr.bf16.mxu0 %v4372_v32 }
  0x4a   : > { %3955 = vmatprep.subr.bf16.mxu1 %v4373_v33 }
  0x4c   : > { %3940 = vmatpush3.bf16.msra.mxu0 %v4372_v32 }
  0x4d   : > { %3956 = vmatpush3.bf16.msra.mxu1 %v4373_v33  ;;  %3941 = vmatprep.subr.bf16.mxu0 %v4374_v34 }
  0x4e   : > { %3957 = vmatprep.subr.bf16.mxu1 %v4375_v35 }
  0x50   : > { %3942 = vmatpush3.bf16.msra.mxu0 %v4374_v34 }
  0x51   : > { %3958 = vmatpush3.bf16.msra.mxu1 %v4375_v35  ;;  %3943 = vmatprep.subr.bf16.mxu0 %v4376_v36 }
  0x52   : > { %3959 = vmatprep.subr.bf16.mxu1 %v4377_v37 }
  0x54   : > { %3944 = vmatpush3.bf16.msra.mxu0 %v4376_v36 }
  0x55   : > { %3960 = vmatpush3.bf16.msra.mxu1 %v4377_v37  ;;  %3965 = vmatprep.subr.bf16.mxu0 %v4378_v38 }
  0x56   : > { %3981 = vmatprep.subr.bf16.mxu1 %v4379_v39 }
  0x57   : > { %3946 = vmatmul.mubr.msk.bf16.vlgmr.msra.gmra.mrb[8].mxu0 %vm447_vm0, %v4731_v15 }
  0x58   : > { %3962 = vmatmul.mubr.msk.bf16.vlgmr.msra.gmra.mrb[8].mxu1 %vm447_vm0, %v4731_v15  ;;  %3966 = vmatpush3.bf16.msra.mxu0 %v4378_v38 }
  0x59   : > { %3982 = vmatpush3.bf16.msra.mxu1 %v4379_v39  ;;  %3967 = vmatprep.subr.bf16.mxu0 %v4380_v40 }
  0x5a   : > { %3983 = vmatprep.subr.bf16.mxu1 %v4381_v41  ;;  %3977 = vmatprep.mubr.msk.bf16.mxu0 %vm447_vm0, %v4710_v9 }
  0x5b   : > { %3993 = vmatprep.mubr.msk.bf16.mxu1 %vm447_vm0, %v4710_v9 }
  0x5c   : > { %3968 = vmatpush3.bf16.msra.mxu0 %v4380_v40 }
  0x5d   : > { %3984 = vmatpush3.bf16.msra.mxu1 %v4381_v41  ;;  %3969 = vmatprep.subr.bf16.mxu0 %v4382_v42 }
  0x5e   : > { %3985 = vmatprep.subr.bf16.mxu1 %v4383_v43 }
  0x60   : > { %3970 = vmatpush3.bf16.msra.mxu0 %v4382_v42 }
  0x61   : > { %3986 = vmatpush3.bf16.msra.mxu1 %v4383_v43  ;;  %3971 = vmatprep.subr.bf16.mxu0 %v4384_v44 }
  0x62   : > { %3987 = vmatprep.subr.bf16.mxu1 %v4385_v45 }
  0x64   : > { %3972 = vmatpush3.bf16.msra.mxu0 %v4384_v44 }
  0x65   : > { %3988 = vmatpush3.bf16.msra.mxu1 %v4385_v45  ;;  %3973 = vmatprep.subr.bf16.mxu0 %v4386_v46 }
  0x66   : > { %3989 = vmatprep.subr.bf16.mxu1 %v4387_v47 }
  0x68   : > { %3974 = vmatpush3.bf16.msra.mxu0 %v4386_v46 }
  0x69   : > { %3990 = vmatpush3.bf16.msra.mxu1 %v4387_v47  ;;  %3975 = vmatprep.subr.bf16.mxu0 %v4388_v48 }
  0x6a   : > { %3991 = vmatprep.subr.bf16.mxu1 %v4389_v49 }
  0x6c   : > { %3976 = vmatpush3.bf16.msra.mxu0 %v4388_v48 }
  0x6d   : > { %3992 = vmatpush3.bf16.msra.mxu1 %v4389_v49  ;;  %3997 = vmatprep.subr.bf16.mxu0 %v4390_v50 }
  0x6e   : > { %4013 = vmatprep.subr.bf16.mxu1 %v4391_v51 }
  0x6f   : > { %3978 = vmatmul.mubr.msk.bf16.vlgmr.msra.gmra.mrb[12].mxu0 %vm447_vm0, %v4731_v15 }
  0x70   : > { %3994 = vmatmul.mubr.msk.bf16.vlgmr.msra.gmra.mrb[12].mxu1 %vm447_vm0, %v4731_v15  ;;  %3998 = vmatpush3.bf16.msra.mxu0 %v4390_v50 }
  0x71   : > { %4014 = vmatpush3.bf16.msra.mxu1 %v4391_v51  ;;  %3999 = vmatprep.subr.bf16.mxu0 %v4392_v52 }
  0x72   : > { %4015 = vmatprep.subr.bf16.mxu1 %v4393_v53  ;;  %4009 = vmatprep.mubr.msk.bf16.mxu0 %vm447_vm0, %v4710_v9 }
  0x73   : > { %4025 = vmatprep.mubr.msk.bf16.mxu1 %vm447_vm0, %v4710_v9  ;;  %v4412_v9 = vld [vmem:[%s5451_s3 + $0x28] ss:$0 sps:$4 sm:$0x33]  }
  0x74   : > { %4000 = vmatpush3.bf16.msra.mxu0 %v4392_v52  ;;  %v1559_v11 = vsel %vm1557_vm2, %v4412_v9, 0 }
  0x75   : > { %4016 = vmatpush3.bf16.msra.mxu1 %v4393_v53  ;;  %4001 = vmatprep.subr.bf16.mxu0 %v4394_v54 }
  0x76   : > { %4017 = vmatprep.subr.bf16.mxu1 %v4395_v55 }
  0x78   : > { %4002 = vmatpush3.bf16.msra.mxu0 %v4394_v54 }
  0x79   : > { %4018 = vmatpush3.bf16.msra.mxu1 %v4395_v55  ;;  %4003 = vmatprep.subr.bf16.mxu0 %v4396_v56 }
  0x7a   : > { %4019 = vmatprep.subr.bf16.mxu1 %v4397_v57 }
  0x7c   : > { %4004 = vmatpush3.bf16.msra.mxu0 %v4396_v56 }
  0x7d   : > { %4020 = vmatpush3.bf16.msra.mxu1 %v4397_v57  ;;  %4005 = vmatprep.subr.bf16.mxu0 %v4398_v58 }
  0x7e   : > { %4021 = vmatprep.subr.bf16.mxu1 %v4399_v59 }
  0x80   : > { %4006 = vmatpush3.bf16.msra.mxu0 %v4398_v58 }
  0x81   : > { %4022 = vmatpush3.bf16.msra.mxu1 %v4399_v59  ;;  %4007 = vmatprep.subr.bf16.mxu0 %v4400_v60 }
  0x82   : > { %4023 = vmatprep.subr.bf16.mxu1 %v4401_v61 }
  0x84   : > { %4008 = vmatpush3.bf16.msra.mxu0 %v4400_v60 }
  0x85   : > { %4024 = vmatpush3.bf16.msra.mxu1 %v4401_v61  ;;  %4029 = vmatprep.subr.bf16.mxu0 %v4567_v0 }
  0x86   : > { %4045 = vmatprep.subr.bf16.mxu1 %v4567_v0 }
  0x87   : > { %4010 = vmatmul.mubr.msk.bf16.vlgmr.msra.gmra.mrb[16].mxu0 %vm447_vm0, %v4731_v15 }
  0x88   : > { %4026 = vmatmul.mubr.msk.bf16.vlgmr.msra.gmra.mrb[16].mxu1 %vm447_vm0, %v4731_v15  ;;  %4030 = vmatpush3.bf16.msra.mxu0 %v4402_v62 }
  0x89   : > { %4046 = vmatpush3.bf16.msra.mxu1 %v4403_v63  ;;  %4031 = vmatprep.subr.bf16.mxu0 %v4567_v0 }
  0x8a   : > { %4047 = vmatprep.subr.bf16.mxu1 %v4567_v0  ;;  %4041 = vmatprep.mubr.msk.bf16.mxu0 %vm4568_vm3, %v4567_v0 }
  0x8b   : > { %4057 = vmatprep.mubr.msk.bf16.mxu1 %vm4568_vm3, %v4567_v0 }
  0x8c   : > { %4032 = vmatpush3.bf16.msra.mxu0 %v4404_v1 }
  0x8d   : > { %4048 = vmatpush3.bf16.msra.mxu1 %v4405_v2  ;;  %4033 = vmatprep.subr.bf16.mxu0 %v4567_v0 }
  0x8e   : > { %4049 = vmatprep.subr.bf16.mxu1 %v4567_v0 }
  0x90   : > { %4034 = vmatpush3.bf16.msra.mxu0 %v4406_v3 }
  0x91   : > { %4050 = vmatpush3.bf16.msra.mxu1 %v4407_v4  ;;  %4035 = vmatprep.subr.bf16.mxu0 %v4567_v0 }
  0x92   : > { %4051 = vmatprep.subr.bf16.mxu1 %v4567_v0 }
  0x94   : > { %4036 = vmatpush3.bf16.msra.mxu0 %v4408_v5 }
  0x95   : > { %4052 = vmatpush3.bf16.msra.mxu1 %v4409_v6  ;;  %4037 = vmatprep.subr.bf16.mxu0 %v4567_v0 }
  0x96   : > { %4053 = vmatprep.subr.bf16.mxu1 %v4567_v0 }
  0x98   : > { %4038 = vmatpush3.bf16.msra.mxu0 %v4410_v7 }
  0x99   : > { %4054 = vmatpush3.bf16.msra.mxu1 %v4411_v8  ;;  %4039 = vmatprep.subr.bf16.mxu0 %v4567_v0 }
  0x9a   : > { %4055 = vmatprep.subr.bf16.mxu1 %v4567_v0 }
  0x9c   : > { %4040 = vmatpush3.bf16.msra.mxu0 %v1559_v11 }
  0x9d   : > { %4056 = vmatpush3.bf16.msra.mxu1 %v1648_v12  ;;  %4061 = vmatprep.subr.bf16.mxu0 %v4567_v0 }
  0x9e   : > { %4077 = vmatprep.subr.bf16.mxu1 %v4567_v0 }
  0xfa   : > { %v3883_v13 = vpop.f32.mrb[0].mxu0 }
  0xfb   : > { %v3899_v14 = vpop.f32.mrb[0].mxu1  ;;  %v488_v15 = vpop.f32.mrb[1].mxu0 }
  0xfc   : > { %v586_v16 = vpop.f32.mrb[1].mxu1  ;;  %v3884_v17 = vpop.f32.mrb[2].mxu0 }
  0xfd   : > { %v605_v18 = vrot.slane %v586_v16, 1  ;;  %v3900_v19 = vpop.f32.mrb[2].mxu1  ;;  %v491_v20 = vpop.f32.mrb[3].mxu0 }
  0xfe   : > { %v603_v21 = vadd.f32 %v3900_v19, %v3883_v13  ;;  %v602_v22 = vadd.f32 %v3899_v14, %v491_v20  ;;  %v589_v23 = vpop.f32.mrb[3].mxu1 }
  0xff   : > { %v607_v24 = vadd.f32 %v3884_v17, %v605_v18  ;;  %v601_v25 = vadd.f32 %v589_v23, %v488_v15 }
 0x112   : > { %v3915_v26 = vpop.f32.mrb[4].mxu0 }
 0x113   : > { %v706_v27 = vadd.f32 %v3915_v26, %v601_v25  ;;  %v3931_v28 = vpop.f32.mrb[4].mxu1  ;;  %v691_v29 = vpop.f32.mrb[5].mxu0 }
 0x114   : > { %v709_v30 = vrot.slane %v691_v29, 1  ;;  %v799_v31 = vpop.f32.mrb[5].mxu1  ;;  %v3916_v32 = vpop.f32.mrb[6].mxu0  ;;  %v824_v43 = vrot.slane %v3931_v28, 1 }
 0x115   : > { %v816_v33 = vrot.slane %v799_v31, 1  ;;  %v707_v34 = vadd.f32 %v3916_v32, %v602_v22  ;;  %v3932_v35 = vpop.f32.mrb[6].mxu1  ;;  %v694_v36 = vpop.f32.mrb[7].mxu0 }
 0x116   : > { %v711_v37 = vadd.f32 %v709_v30, %v603_v21  ;;  %v814_v38 = vadd.f32 %v3932_v35, %v706_v27  ;;  %v713_v39 = vrot.slane %v694_v36, 1  ;;  %v802_v40 = vpop.f32.mrb[7].mxu1 }
 0x117   : > { %v818_v41 = vadd.f32 %v816_v33, %v707_v34  ;;  %v820_v42 = vrot.slane %v802_v40, 1 }
 0x118   : > { %v715_v44 = vadd.f32 %v713_v39, %v607_v24 }
 0x119   : > { %v822_v45 = vadd.f32 %v820_v42, %v711_v37 }
 0x11a   : > { %v826_v46 = vadd.f32 %v824_v43, %v715_v44 }
 0x12a   : > { %v3947_v47 = vpop.f32.mrb[8].mxu0 }
 0x12b   : > { %v934_v48 = vrot.slane %v3947_v47, 1  ;;  %v3963_v49 = vpop.f32.mrb[8].mxu1  ;;  %v910_v50 = vpop.f32.mrb[9].mxu0 }
 0x12c   : > { %v926_v51 = vrot.slane %v910_v50, 1  ;;  %v1024_v52 = vpop.f32.mrb[9].mxu1  ;;  %v3948_v53 = vpop.f32.mrb[10].mxu0 }
 0x12d   : > { %v936_v54 = vadd.f32 %v934_v48, %v822_v45  ;;  %v938_v55 = vrot.slane %v3948_v53, 1  ;;  %v3964_v56 = vpop.f32.mrb[10].mxu1  ;;  %v913_v57 = vpop.f32.mrb[11].mxu0  ;;  %v4414_v53 = vld [vmem:[%s5451_s3 + $0xb0] sm:$0xff]  }
 0x12e   : > { %v928_v58 = vadd.f32 %v926_v51, %v814_v38  ;;  %v930_v59 = vrot.slane %v913_v57, 1  ;;  %v1027_v60 = vpop.f32.mrb[11].mxu1 }
 0x12f   : > { %v940_v61 = vadd.f32 %v938_v55, %v826_v46  ;;  %v3410_v46 = vld [vmem:[%s5450_s2] ss:$0 sm:$0xff] }
 0x130   : > { %v932_v62 = vadd.f32 %v930_v59, %v818_v41  ;;  %v4417_v59 = vld [vmem:[%s5451_s3 + $0x110] sm:$0xff]  }
 0x142   : > { %v3979_v63 = vpop.f32.mrb[12].mxu0 }
 0x143   : > { %v1138_v1 = vadd.f32 %v3979_v63, %v1027_v60  ;;  %v3995_v2 = vpop.f32.mrb[12].mxu1  ;;  %v1122_v3 = vpop.f32.mrb[13].mxu0  ;;  %v4418_v60 = vld [vmem:[%s5451_s3 + $0xc0] sm:$0xff]  }
 0x144   : > { %v1141_v4 = vrot.slane %v1122_v3, 1  ;;  %v1227_v5 = vpop.f32.mrb[13].mxu1  ;;  %v3980_v6 = vpop.f32.mrb[14].mxu0  ;;  %v4421_v63 = vld [vmem:[%s5451_s3 + $0x120] sm:$0xff]  }
 0x145   : > { %v1245_v7 = vrot.slane %v1227_v5, 1  ;;  %v1139_v8 = vadd.f32 %v3980_v6, %v3963_v49  ;;  %v3996_v9 = vpop.f32.mrb[14].mxu1  ;;  %v1125_v10 = vpop.f32.mrb[15].mxu0  ;;  %v4424_v3 = vld [vmem:[%s5451_s3 + $0xd8] ss:$0 sps:$4 sm:$0x33]  }
 0x146   : > { %v1143_v11 = vadd.f32 %v3964_v56, %v1141_v4  ;;  %v1243_v12 = vadd.f32 %v3996_v9, %v1138_v1  ;;  %v1137_v13 = vadd.f32 %v1125_v10, %v1024_v52  ;;  %v1230_v14 = vpop.f32.mrb[15].mxu1  ;;  %v4422_v1 = vld [vmem:[%s5451_s3 + $0xd0] sm:$0xff]   ;;  %v1749_v5 = vsel %vm1557_vm2, %v4424_v3, 0  ;;  %v4428_v9 = vld [vmem:[%s5451_s3 + $0x168] sm:$0xff]  }
 0x147   : > { %v1247_v15 = vadd.f32 %v1245_v7, %v1139_v8  ;;  %v1249_v16 = vrot.slane %v1230_v14, 1  ;;  %v4425_v4 = vld [vmem:[%s5451_s3 + $0x130] ss:$0 sps:$4 sm:$0x33]   ;;  %v4426_v7 = vld [vmem:[%s5451_s3 + $0x160] sm:$0xff]   ;;  %v4429_v10 = vld [vmem:[%s5451_s3 + $0x34] sm:$0xff]  }
 0x148   : > { %v1242_v17 = vadd.f32 %v3995_v2, %v1137_v13  ;;  %v4423_v2 = vld [vmem:[%s5451_s3 + $0x128] sm:$0xff]   ;;  %v1847_v6 = vsel %vm1557_vm2, %v4425_v4, 0  ;;  %v4432_v13 = vld [vmem:[%s5451_s3 + $0x178] sm:$0xff]  }
 0x149   : > { %v1251_v18 = vadd.f32 %v1249_v16, %v1143_v11  ;;  %v4427_v8 = vld [vmem:[%s5451_s3 + $0x2c] sm:$0xff]   ;;  %v4433_v14 = vld [vmem:[%s5451_s3 + $0x44] sm:$0xff]  }
 0x14a   : > { %v4430_v11 = vld [vmem:[%s5451_s3 + $0x170] sm:$0xff]  }
 0x14b   : > { %v4435_v16 = vld [vmem:[%s5451_s3 + $0x4c] sm:$0xff]  }
 0x15a   : > { %v4011_v19 = vpop.f32.mrb[16].mxu0 }
 0x15b   : > { %v1360_v20 = vrot.slane %v4011_v19, 1  ;;  %v4027_v21 = vpop.f32.mrb[16].mxu1  ;;  %v1335_v22 = vpop.f32.mrb[17].mxu0 }
 0x15c   : > { %v1352_v23 = vrot.slane %v1335_v22, 1  ;;  %v1446_v24 = vpop.f32.mrb[17].mxu1  ;;  %v4012_v25 = vpop.f32.mrb[18].mxu0  ;;  %v1470_v37 = vrot.slane %v4027_v21, 1  ;;  %v4438_v21 = vld [vmem:[%s5451_s3 + $0x84] sm:$0xff]   ;;  %v4439_v22 = vld [vmem:[%s5451_s3 + $0xdc] sm:$0xff]  }
 0x15d   : > { %v1362_v26 = vadd.f32 %v1360_v20, %v1251_v18  ;;  %v1462_v27 = vrot.slane %v1446_v24, 1  ;;  %v1350_v28 = vadd.f32 %v4012_v25, %v1242_v17  ;;  %v4028_v29 = vpop.f32.mrb[18].mxu1  ;;  %v1338_v30 = vpop.f32.mrb[19].mxu0  ;;  %v4436_v17 = vld [vmem:[%s5451_s3 + $0x188] ss:$0 sps:$4 sm:$0x33]  }
 0x15e   : > { %v1354_v31 = vadd.f32 %v1352_v23, %v1243_v12  ;;  %v1474_v32 = vrot.slane %v4028_v29, 1  ;;  %v1356_v33 = vrot.slane %v1338_v30, 1  ;;  %v1449_v34 = vpop.f32.mrb[19].mxu1  ;;  %v4431_v12 = vld [vmem:[%s5451_s3 + $0x3c] sm:$0xff]   ;;  %v1942_v19 = vsel %vm1557_vm2, %v4436_v17, 0  ;;  %v4440_v23 = vld [vmem:[%s5451_s3 + $0x8c] sm:$0xff]  }
 0x15f   : > { %v1464_v35 = vadd.f32 %v1462_v27, %v1350_v28  ;;  %v1466_v36 = vrot.slane %v1449_v34, 1  ;;  %v4437_v18 = vld [vmem:[%s5451_s3 + $0x54] ss:$0 sps:$4 sm:$0x33]   ;;  %v4441_v24 = vld [vmem:[%s5451_s3 + $0xe4] sm:$0xff]   ;;  %v4444_v27 = vld [vmem:[%s5451_s3 + $0x9c] sm:$0xff]  }
 0x160   : > { %v1476_v38 = vadd.f32 %v1474_v32, %v1362_v26  ;;  %v1358_v39 = vadd.f32 %v1356_v33, %v1247_v15  ;;  %v4434_v15 = vld [vmem:[%s5451_s3 + $0x180] sm:$0xff]   ;;  %v2040_v20 = vsel %vm1557_vm2, %v4437_v18, 0  ;;  %v4442_v25 = vld [vmem:[%s5451_s3 + $0x94] sm:$0xff]   ;;  %v4443_v26 = vld [vmem:[%s5451_s3 + $0xec] sm:$0xff]  }
 0x161   : > { %v1477_v40 = vmax.f32 %v928_v58, %v1464_v35  ;;  %v1468_v41 = vadd.f32 %v1466_v36, %v1354_v31  ;;  %v4416_v58 = vld [vmem:[%s5451_s3 + $0xb8] sm:$0xff]   ;;  %v4446_v29 = vld [vmem:[%s5451_s3 + $0xa4] sm:$0xff]   ;;  %v4448_v31 = vld [vmem:[%s5451_s3 + $0xac] ss:$0 sps:$4 sm:$0x33]  }
 0x162   : > { %v1480_v42 = vmax.f32 %v940_v61, %v1476_v38  ;;  %v1472_v43 = vadd.f32 %v1470_v37, %v1358_v39  ;;  %v4419_v61 = vld [vmem:[%s5451_s3 + $0x118] sm:$0xff]   ;;  %v4449_v32 = vld [vmem:[%s5451_s3 + $0x104] ss:$0 sps:$4 sm:$0x33]   ;;  %v2129_v33 = vsel %vm1557_vm2, %v4448_v31, 0  ;;  %v4451_v36 = vld [vmem:[%s5451_s3 + $0x18c] sm:$0xff]  }
 0x163   : > { %v1478_v44 = vmax.f32 %v932_v62, %v1468_v41  ;;  %v4420_v62 = vld [vmem:[%s5451_s3 + $0xc8] sm:$0xff]   ;;  %v4445_v28 = vld [vmem:[%s5451_s3 + $0xf4] sm:$0xff]   ;;  %v4447_v30 = vld [vmem:[%s5451_s3 + $0xfc] sm:$0xff]   ;;  %v2229_v34 = vsel %vm1557_vm2, %v4449_v32, 0 }
 0x164   : > { %v1479_v45 = vmax.f32 %v936_v54, %v1472_v43  ;;  %v4415_v54 = vld [vmem:[%s5451_s3 + $0x108] sm:$0xff]   ;;  %v4450_v35 = vld [vmem:[%s5451_s3 + $0x134] sm:$0xff]   ;;  %v4452_v37 = vld [vmem:[%s5451_s3 + $0x13c] sm:$0xff]  }
 0x165   : > { %v1481_v47 = vmax.f32 %v1477_v40, %v1478_v44  ;;  %v4453_v38 = vld [vmem:[%s5451_s3 + $0x194] sm:$0xff]   ;;  %v4454_v39 = vld [vmem:[%s5451_s3 + $0x144] sm:$0xff]   ;;  %v4455_v40 = vld [vmem:[%s5451_s3 + $0x19c] sm:$0xff]  }
 0x166   : > { %v1493_v48 = vmax.f32 %v1479_v45, %v1480_v42  ;;  %v4456_v41 = vld [vmem:[%s5451_s3 + $0x14c] sm:$0xff]   ;;  %v4457_v42 = vld [vmem:[%s5451_s3 + $0x1a4] sm:$0xff]   ;;  %v4458_v43 = vld [vmem:[%s5451_s3 + $0x154] sm:$0xff]  }
 0x167   : > { %v1489_v49 = vadd.f32 %v3410_v46, %v1481_v47  ;;  %v4459_v44 = vld [vmem:[%s5451_s3 + $0x1ac] sm:$0xff]   ;;  %v4460_v45 = vld [vmem:[%s5451_s3 + $0x15c] ss:$0 sps:$4 sm:$0x33]  }
 0x168   : > { %v1501_v50 = vadd.f32 %v3410_v46, %v1493_v48  ;;  %v4461_v46 = vld [vmem:[%s5451_s3 + $0x1b4] ss:$0 sps:$4 sm:$0x33]   ;;  %v2327_v47 = vsel %vm1557_vm2, %v4460_v45, 0 }
 0x169   : > { %v1490_v51 = vmax.f32 %v1489_v49, 0.0  ;;  %v2422_v48 = vsel %vm1557_vm2, %v4461_v46, 0  ;;  %v4462_v49 = vld [vmem:[%s5453_s5 + $0x28] sm:$0xff]  }
 0x16a   : > { %v1502_v52 = vmax.f32 %v1501_v50, 0.0  ;;  %v4463_v50 = vld [vmem:[%s5453_s5] sm:$0xff]  }
 0x16b   : > { %1492 = vst.msk [vmem:[#allocation2] sm:$0x7f] %vm1491_vm4, %v1490_v51  ;;  %v4464_v51 = vld [vmem:[%s5453_s5 + $0x30] sm:$0xff]  }
 0x16c   : > { %1503 = vst.msk [vmem:[#allocation2 + $0x7] sm:$0x7f] %vm1491_vm4, %v1502_v52  ;;  %v4465_v52 = vld [vmem:[%s5453_s5 + $0x8] sm:$0xff]  }
 0x173   : > { %v1506_v55 = vld [vmem:[#allocation2] sm:$0xff]  ;;  %v1507_v56 = vld [vmem:[#allocation2 + $0x8] sm:$0xff] }
 0x174   : > { %v4973_v57 = vpack.c.bf16 %v1507_v56, %v1506_v55  ;;  %v4467_v55 = vld [vmem:[%s5453_s5 + $0x10] sm:$0xff]   ;;  %v4468_v56 = vld [vmem:[%s5453_s5 + $0x40] sm:$0xff]  }
 0x176   : > { %4042 = vmatmul.mubr.msk.bf16.vlgmr.msra.gmra.mrb[20].mxu0 %vm1553_vm5, %v4973_v57  ;;  %4058 = vmatmul.mubr.msk.bf16.vlgmr.msra.gmra.mrb[20].mxu1 %vm1553_vm5, %v4973_v57 }
 0x177   : > { %4062 = vmatpush3.bf16.msra.mxu0 %v4414_v53  ;;  %4078 = vmatpush3.bf16.msra.mxu1 %v4415_v54  ;;  %v4466_v53 = vld [vmem:[%s5453_s5 + $0x38] sm:$0xff]  }
 0x178   : > { %4063 = vmatprep.subr.bf16.mxu0 %v4567_v0  ;;  %4079 = vmatprep.subr.bf16.mxu1 %v4567_v0  ;;  %v4469_v54 = vld [vmem:[%s5453_s5 + $0x18] sm:$0xff]  }
 0x179   : > { %4073 = vmatprep.mubr.msk.bf16.mxu0 %vm4568_vm3, %v4567_v0  ;;  %4089 = vmatprep.mubr.msk.bf16.mxu1 %vm4568_vm3, %v4567_v0 }
 0x17b   : > { %4064 = vmatpush3.bf16.msra.mxu0 %v4416_v58  ;;  %4080 = vmatpush3.bf16.msra.mxu1 %v4417_v59  ;;  %v4471_v58 = vld [vmem:[%s5453_s5 + $0x20] sm:$0xff]  }
 0x17c   : > { %4065 = vmatprep.subr.bf16.mxu0 %v4567_v0  ;;  %4081 = vmatprep.subr.bf16.mxu1 %v4567_v0 }
 0x17f   : > { %4066 = vmatpush3.bf16.msra.mxu0 %v4418_v60  ;;  %4082 = vmatpush3.bf16.msra.mxu1 %v4419_v61 }
 0x180   : > { %4067 = vmatprep.subr.bf16.mxu0 %v4567_v0  ;;  %4083 = vmatprep.subr.bf16.mxu1 %v4567_v0 }
 0x183   : > { %4068 = vmatpush3.bf16.msra.mxu0 %v4420_v62  ;;  %4084 = vmatpush3.bf16.msra.mxu1 %v4421_v63 }
 0x184   : > { %4069 = vmatprep.subr.bf16.mxu0 %v4567_v0  ;;  %4085 = vmatprep.subr.bf16.mxu1 %v4567_v0 }
 0x187   : > { %4070 = vmatpush3.bf16.msra.mxu0 %v4422_v1  ;;  %4086 = vmatpush3.bf16.msra.mxu1 %v4423_v2 }
 0x188   : > { %4071 = vmatprep.subr.bf16.mxu0 %v4567_v0  ;;  %4087 = vmatprep.subr.bf16.mxu1 %v4567_v0 }
 0x18b   : > { %4072 = vmatpush3.bf16.msra.mxu0 %v1749_v5  ;;  %4088 = vmatpush3.bf16.msra.mxu1 %v1847_v6 }
 0x18c   : > { %4093 = vmatprep.subr.bf16.mxu0 %v4567_v0  ;;  %4109 = vmatprep.subr.bf16.mxu1 %v4567_v0 }
 0x18e   : > { %4074 = vmatmul.mubr.msk.bf16.vlgmr.msra.gmra.mrb[24].mxu0 %vm1553_vm5, %v4973_v57  ;;  %4090 = vmatmul.mubr.msk.bf16.vlgmr.msra.gmra.mrb[24].mxu1 %vm1553_vm5, %v4973_v57 }
 0x18f   : > { %4094 = vmatpush3.bf16.msra.mxu0 %v4426_v7  ;;  %4110 = vmatpush3.bf16.msra.mxu1 %v4427_v8 }
 0x190   : > { %4095 = vmatprep.subr.bf16.mxu0 %v4567_v0  ;;  %4111 = vmatprep.subr.bf16.mxu1 %v4567_v0 }
 0x191   : > { %4105 = vmatprep.mubr.msk.bf16.mxu0 %vm4568_vm3, %v4567_v0  ;;  %4121 = vmatprep.mubr.msk.bf16.mxu1 %vm4568_vm3, %v4567_v0 }
 0x193   : > { %4096 = vmatpush3.bf16.msra.mxu0 %v4428_v9  ;;  %4112 = vmatpush3.bf16.msra.mxu1 %v4429_v10 }
 0x194   : > { %4097 = vmatprep.subr.bf16.mxu0 %v4567_v0  ;;  %4113 = vmatprep.subr.bf16.mxu1 %v4567_v0 }
 0x197   : > { %4098 = vmatpush3.bf16.msra.mxu0 %v4430_v11  ;;  %4114 = vmatpush3.bf16.msra.mxu1 %v4431_v12 }
 0x198   : > { %4099 = vmatprep.subr.bf16.mxu0 %v4567_v0  ;;  %4115 = vmatprep.subr.bf16.mxu1 %v4567_v0 }
 0x19b   : > { %4100 = vmatpush3.bf16.msra.mxu0 %v4432_v13  ;;  %4116 = vmatpush3.bf16.msra.mxu1 %v4433_v14 }
 0x19c   : > { %4101 = vmatprep.subr.bf16.mxu0 %v4567_v0  ;;  %4117 = vmatprep.subr.bf16.mxu1 %v4567_v0 }
 0x19f   : > { %4102 = vmatpush3.bf16.msra.mxu0 %v4434_v15  ;;  %4118 = vmatpush3.bf16.msra.mxu1 %v4435_v16 }
 0x1a0   : > { %4103 = vmatprep.subr.bf16.mxu0 %v4567_v0  ;;  %4119 = vmatprep.subr.bf16.mxu1 %v4567_v0 }
 0x1a3   : > { %4104 = vmatpush3.bf16.msra.mxu0 %v1942_v19  ;;  %4120 = vmatpush3.bf16.msra.mxu1 %v2040_v20 }
 0x1a4   : > { %4125 = vmatprep.subr.bf16.mxu0 %v4567_v0  ;;  %4141 = vmatprep.subr.bf16.mxu1 %v4567_v0 }
 0x1a6   : > { %4106 = vmatmul.mubr.msk.bf16.vlgmr.msra.gmra.mrb[28].mxu0 %vm1553_vm5, %v4973_v57  ;;  %4122 = vmatmul.mubr.msk.bf16.vlgmr.msra.gmra.mrb[28].mxu1 %vm1553_vm5, %v4973_v57 }
 0x1a7   : > { %4126 = vmatpush3.bf16.msra.mxu0 %v4438_v21  ;;  %4142 = vmatpush3.bf16.msra.mxu1 %v4439_v22 }
 0x1a8   : > { %4127 = vmatprep.subr.bf16.mxu0 %v4567_v0  ;;  %4143 = vmatprep.subr.bf16.mxu1 %v4567_v0 }
 0x1a9   : > { %4137 = vmatprep.mubr.msk.bf16.mxu0 %vm4568_vm3, %v4567_v0  ;;  %4153 = vmatprep.mubr.msk.bf16.mxu1 %vm4568_vm3, %v4567_v0 }
 0x1ab   : > { %4128 = vmatpush3.bf16.msra.mxu0 %v4440_v23  ;;  %4144 = vmatpush3.bf16.msra.mxu1 %v4441_v24 }
 0x1ac   : > { %4129 = vmatprep.subr.bf16.mxu0 %v4567_v0  ;;  %4145 = vmatprep.subr.bf16.mxu1 %v4567_v0 }
 0x1af   : > { %4130 = vmatpush3.bf16.msra.mxu0 %v4442_v25  ;;  %4146 = vmatpush3.bf16.msra.mxu1 %v4443_v26 }
 0x1b0   : > { %4131 = vmatprep.subr.bf16.mxu0 %v4567_v0  ;;  %4147 = vmatprep.subr.bf16.mxu1 %v4567_v0 }
 0x1b3   : > { %4132 = vmatpush3.bf16.msra.mxu0 %v4444_v27  ;;  %4148 = vmatpush3.bf16.msra.mxu1 %v4445_v28 }
 0x1b4   : > { %4133 = vmatprep.subr.bf16.mxu0 %v4567_v0  ;;  %4149 = vmatprep.subr.bf16.mxu1 %v4567_v0 }
 0x1b7   : > { %4134 = vmatpush3.bf16.msra.mxu0 %v4446_v29  ;;  %4150 = vmatpush3.bf16.msra.mxu1 %v4447_v30 }
 0x1b8   : > { %4135 = vmatprep.subr.bf16.mxu0 %v4567_v0  ;;  %4151 = vmatprep.subr.bf16.mxu1 %v4567_v0 }
 0x1bb   : > { %4136 = vmatpush3.bf16.msra.mxu0 %v2129_v33  ;;  %4152 = vmatpush3.bf16.msra.mxu1 %v2229_v34 }
 0x1bc   : > { %4157 = vmatprep.subr.bf16.mxu0 %v4567_v0  ;;  %4173 = vmatprep.subr.bf16.mxu1 %v4567_v0 }
 0x1be   : > { %4138 = vmatmul.mubr.msk.bf16.vlgmr.msra.gmra.mrb[32].mxu0 %vm1553_vm5, %v4973_v57  ;;  %4154 = vmatmul.mubr.msk.bf16.vlgmr.msra.gmra.mrb[32].mxu1 %vm1553_vm5, %v4973_v57 }
 0x1bf   : > { %4158 = vmatpush3.bf16.msra.mxu0 %v4450_v35  ;;  %4174 = vmatpush3.bf16.msra.mxu1 %v4451_v36 }
 0x1c0   : > { %4159 = vmatprep.subr.bf16.mxu0 %v4567_v0  ;;  %4175 = vmatprep.subr.bf16.mxu1 %v4567_v0 }
 0x1c1   : > { %4169 = vmatprep.mubr.msk.bf16.mxu0 %vm4568_vm3, %v4567_v0  ;;  %4185 = vmatprep.mubr.msk.bf16.mxu1 %vm4568_vm3, %v4567_v0 }
 0x1c3   : > { %4160 = vmatpush3.bf16.msra.mxu0 %v4452_v37  ;;  %4176 = vmatpush3.bf16.msra.mxu1 %v4453_v38 }
 0x1c4   : > { %4161 = vmatprep.subr.bf16.mxu0 %v4567_v0  ;;  %4177 = vmatprep.subr.bf16.mxu1 %v4567_v0 }
 0x1c7   : > { %4162 = vmatpush3.bf16.msra.mxu0 %v4454_v39  ;;  %4178 = vmatpush3.bf16.msra.mxu1 %v4455_v40 }
 0x1c8   : > { %4163 = vmatprep.subr.bf16.mxu0 %v4567_v0  ;;  %4179 = vmatprep.subr.bf16.mxu1 %v4567_v0 }
 0x1cb   : > { %4164 = vmatpush3.bf16.msra.mxu0 %v4456_v41  ;;  %4180 = vmatpush3.bf16.msra.mxu1 %v4457_v42 }
 0x1cc   : > { %4165 = vmatprep.subr.bf16.mxu0 %v4567_v0  ;;  %4181 = vmatprep.subr.bf16.mxu1 %v4567_v0 }
 0x1cf   : > { %4166 = vmatpush3.bf16.msra.mxu0 %v4458_v43  ;;  %4182 = vmatpush3.bf16.msra.mxu1 %v4459_v44 }
 0x1d0   : > { %4167 = vmatprep.subr.bf16.mxu0 %v4567_v0  ;;  %4183 = vmatprep.subr.bf16.mxu1 %v4567_v0 }
 0x1d3   : > { %4168 = vmatpush3.bf16.msra.mxu0 %v2327_v47  ;;  %4184 = vmatpush3.bf16.msra.mxu1 %v2422_v48 }
 0x1d4   : > { %4189 = vmatprep.subr.bf16.mxu0 %v4567_v0  ;;  %4203 = vmatprep.subr.bf16.mxu1 %v4567_v0 }
 0x1d6   : > { %4170 = vmatmul.mubr.msk.bf16.vlgmr.msra.gmra.mrb[36].mxu0 %vm1553_vm5, %v4973_v57  ;;  %4186 = vmatmul.mubr.msk.bf16.vlgmr.msra.gmra.mrb[36].mxu1 %vm1553_vm5, %v4973_v57  ;;  %v4470_v57 = vld [vmem:[%s5453_s5 + $0x48] sm:$0xff]  }
 0x1d7   : > { %4199 = vmatprep.mubr.msk.bf16.mxu0 %vm4568_vm3, %v4567_v0  ;;  %4213 = vmatprep.mubr.msk.bf16.mxu1 %vm4568_vm3, %v4567_v0 }
 0x1d8   : > { %4190 = vmatpush3.bf16.msra.mxu0 %v4462_v49  ;;  %4204 = vmatpush3.bf16.msra.mxu1 %v4463_v50 }
 0x1d9   : > { %4191 = vmatprep.subr.bf16.mxu0 %v4567_v0  ;;  %4205 = vmatprep.subr.bf16.mxu1 %v4567_v0 }
 0x1dc   : > { %4192 = vmatpush3.bf16.msra.mxu0 %v4464_v51  ;;  %4206 = vmatpush3.bf16.msra.mxu1 %v4465_v52 }
 0x1dd   : > { %4193 = vmatprep.subr.bf16.mxu0 %v4567_v0  ;;  %4207 = vmatprep.subr.bf16.mxu1 %v4567_v0 }
 0x1e0   : > { %4194 = vmatpush3.bf16.msra.mxu0 %v4466_v53  ;;  %4208 = vmatpush3.bf16.msra.mxu1 %v4467_v55 }
 0x1e1   : > { %4195 = vmatprep.subr.bf16.mxu0 %v4567_v0  ;;  %4209 = vmatprep.subr.bf16.mxu1 %v4567_v0 }
 0x1e4   : > { %4196 = vmatpush3.bf16.msra.mxu0 %v4468_v56  ;;  %4210 = vmatpush3.bf16.msra.mxu1 %v4469_v54 }
 0x1e5   : > { %4197 = vmatprep.subr.bf16.mxu0 %v4567_v0  ;;  %4211 = vmatprep.subr.bf16.mxu1 %v4567_v0 }
 0x1e8   : > { %4198 = vmatpush3.bf16.msra.mxu0 %v4470_v57  ;;  %4212 = vmatpush3.bf16.msra.mxu1 %v4471_v58 }
 0x1e9   : > { %4217 = vmatprep.subr.bf16.mxu0 %v4567_v0  ;;  %4231 = vmatprep.subr.bf16.mxu1 %v4567_v0 }
 0x249   : > { %v1595_v59 = vpop.f32.mrb[20].mxu0  ;;  %v1684_v60 = vpop.f32.mrb[20].mxu1 }
 0x24a   : > { %v1699_v61 = vrot.slane %v1684_v60, 2  ;;  %v4043_v62 = vpop.f32.mrb[21].mxu0  ;;  %v4059_v63 = vpop.f32.mrb[21].mxu1  ;;  %v1694_v3 = vrot.slane %v1684_v60, 7 }
 0x24b   : > { %v1598_v1 = vpop.f32.mrb[22].mxu0  ;;  %v1687_v2 = vpop.f32.mrb[22].mxu1 }
 0x24c   : > { %v1701_v4 = vadd.f32 %v1699_v61, %v1595_v59  ;;  %v1702_v5 = vadd.f32 %v1699_v61, %v1598_v1  ;;  %v1695_v6 = vrot.slane %v1687_v2, 7  ;;  %v4044_v7 = vpop.f32.mrb[23].mxu0  ;;  %v4060_v8 = vpop.f32.mrb[23].mxu1 }
 0x24e   : > { %v1696_v9 = vsel %vm1693_vm6, %v1694_v3, %v1695_v6 }
 0x24f   : > { %v1698_v10 = vadd.f32 %v1696_v9, %v1595_v59 }
 0x261   : > { %v1785_v11 = vpop.f32.mrb[24].mxu0  ;;  %v1883_v12 = vpop.f32.mrb[24].mxu1 }
 0x262   : > { %v1793_v13 = vrot.slane %v1785_v11, 1  ;;  %v4075_v14 = vpop.f32.mrb[25].mxu0  ;;  %v4091_v15 = vpop.f32.mrb[25].mxu1  ;;  %v1892_v22 = vrot.slane %v1883_v12, 3 }
 0x263   : > { %v1788_v16 = vpop.f32.mrb[26].mxu0  ;;  %v1886_v17 = vpop.f32.mrb[26].mxu1 }
 0x264   : > { %v1797_v18 = vrot.slane %v1788_v16, 1  ;;  %v1795_v19 = vadd.f32 %v1793_v13, %v1698_v10  ;;  %v4076_v20 = vpop.f32.mrb[27].mxu0  ;;  %v4092_v21 = vpop.f32.mrb[27].mxu1 }
 0x265   : > { %v3580_v21 = vld [vmem:[%s5452_s4] ss:$0 sm:$0xff] }
 0x266   : > { %v1799_v23 = vadd.f32 %v1797_v18, %v1701_v4  ;;  %v1800_v24 = vadd.f32 %v1797_v18, %v1702_v5  ;;  %v1890_v25 = vadd.f32 %v1886_v17, %v1795_v19 }
 0x268   : > { %v1894_v26 = vadd.f32 %v1892_v22, %v1799_v23  ;;  %v1895_v27 = vadd.f32 %v1892_v22, %v1800_v24 }
 0x279   : > { %v1978_v28 = vpop.f32.mrb[28].mxu0  ;;  %v2076_v29 = vpop.f32.mrb[28].mxu1 }
 0x27a   : > { %v1986_v30 = vrot.slane %v1978_v28, 2  ;;  %v4107_v31 = vpop.f32.mrb[29].mxu0  ;;  %v4123_v32 = vpop.f32.mrb[29].mxu1  ;;  %v4473_v28 = vld [vmem:[%s5453_s5 + $0x78] sm:$0xff]  }
 0x27b   : > { %v1981_v33 = vpop.f32.mrb[30].mxu0  ;;  %v2079_v34 = vpop.f32.mrb[30].mxu1  ;;  %v4474_v31 = vld [vmem:[%s5453_s5 + $0x58] sm:$0xff]   ;;  %v4475_v32 = vld [vmem:[%s5453_s5 + $0x80] sm:$0xff]  }
 0x27c   : > { %v1988_v35 = vadd.f32 %v1986_v30, %v1890_v25  ;;  %v1990_v36 = vrot.slane %v1981_v33, 2  ;;  %v4108_v37 = vpop.f32.mrb[31].mxu0  ;;  %v4124_v38 = vpop.f32.mrb[31].mxu1  ;;  %v4472_v25 = vld [vmem:[%s5453_s5 + $0x50] sm:$0xff]   ;;  %v4476_v33 = vld [vmem:[%s5453_s5 + $0x60] sm:$0xff]  }
 0x27d   : > { %v4480_v37 = vld [vmem:[%s5453_s5 + $0x70] sm:$0xff]   ;;  %v4481_v38 = vld [vmem:[%s5453_s5 + $0x98] sm:$0xff]  }
 0x27e   : > { %v1992_v39 = vadd.f32 %v1990_v36, %v1894_v26  ;;  %v1993_v40 = vadd.f32 %v1990_v36, %v1895_v27  ;;  %v4479_v36 = vld [vmem:[%s5453_s5 + $0x90] sm:$0xff]  }
 0x291   : > { %v2165_v41 = vpop.f32.mrb[32].mxu0  ;;  %v2265_v42 = vpop.f32.mrb[32].mxu1 }
 0x292   : > { %v2179_v43 = vrot.slane %v2165_v41, 2  ;;  %v4139_v44 = vpop.f32.mrb[33].mxu0  ;;  %v4155_v45 = vpop.f32.mrb[33].mxu1  ;;  %v2174_v46 = vrot.slane %v2165_v41, 7  ;;  %v2273_v58 = vrot.slane %v2265_v42, 1  ;;  %v4482_v41 = vld [vmem:[%s5453_s5 + $0xa0] sm:$0xff]  }
 0x293   : > { %v2168_v47 = vpop.f32.mrb[34].mxu0  ;;  %v2268_v48 = vpop.f32.mrb[34].mxu1  ;;  %v4483_v44 = vld [vmem:[%s5453_s5 + $0xa8] sm:$0xff]   ;;  %v4484_v45 = vld [vmem:[%s5453_s5 + $0xb0] sm:$0xff]  }
 0x294   : > { %v2181_v49 = vadd.f32 %v2179_v43, %v2076_v29  ;;  %v2182_v50 = vadd.f32 %v2179_v43, %v2079_v34  ;;  %v2175_v51 = vrot.slane %v2168_v47, 7  ;;  %v2277_v52 = vrot.slane %v2268_v48, 1  ;;  %v4140_v53 = vpop.f32.mrb[35].mxu0  ;;  %v4156_v55 = vpop.f32.mrb[35].mxu1  ;;  %v4477_v34 = vld [vmem:[%s5453_s5 + $0x88] sm:$0xff]   ;;  %v4486_v47 = vld [vmem:[%s5453_s5 + $0xc0] sm:$0xff]  }
 0x295   : > { %v4490_v53 = vld [vmem:[%s5455_s7 + $0x18] sm:$0xff]   ;;  %v4491_v55 = vld [vmem:[%s5455_s7 + $0x20] sm:$0xff]  }
 0x296   : > { %v2176_v56 = vsel %vm1693_vm6, %v2174_v46, %v2175_v51  ;;  %v2279_v54 = vadd.f32 %v2277_v52, %v2181_v49  ;;  %v2280_v57 = vadd.f32 %v2277_v52, %v2182_v50  ;;  %v4485_v46 = vld [vmem:[%s5453_s5 + $0xb8] sm:$0xff]   ;;  %v4487_v50 = vld [vmem:[%s5455_s7] sm:$0xff]   ;;  %v4488_v51 = vld [vmem:[%s5455_s7 + $0x8] sm:$0xff]  }
 0x297   : > { %v2178_v59 = vadd.f32 %v2176_v56, %v2076_v29  ;;  %v4489_v52 = vld [vmem:[%s5455_s7 + $0x10] sm:$0xff]   ;;  %v4492_v56 = vld [vmem:[%s5455_s7 + $0x28] sm:$0xff]  }
 0x299   : > { %v2275_v60 = vadd.f32 %v2273_v58, %v2178_v59  ;;  %v4495_v58 = vld [vmem:[%s5457_s9] sm:$0xff]   ;;  %v4496_v59 = vld [vmem:[%s5457_s9 + $0x8] sm:$0xff]  }
 0x2a9   : > { %v2363_v61 = vpop.f32.mrb[36].mxu0  ;;  %v2458_v62 = vpop.f32.mrb[36].mxu1 }
 0x2aa   : > { %v2372_v63 = vrot.slane %v2363_v61, 3  ;;  %v4171_v1 = vpop.f32.mrb[37].mxu0  ;;  %v4187_v2 = vpop.f32.mrb[37].mxu1  ;;  %v2466_v3 = vrot.slane %v2458_v62, 2  ;;  %v4498_v61 = vld [vmem:[%s5457_s9 + $0x18] sm:$0xff]   ;;  %v4499_v62 = vld [vmem:[%s5457_s9 + $0x20] sm:$0xff]  }
 0x2ab   : > { %v2366_v4 = vpop.f32.mrb[38].mxu0  ;;  %v2461_v5 = vpop.f32.mrb[38].mxu1 }
 0x2ac   : > { %v2374_v6 = vadd.f32 %v2372_v63, %v2279_v54  ;;  %v2375_v7 = vadd.f32 %v2372_v63, %v2280_v57  ;;  %v2370_v8 = vadd.f32 %v2366_v4, %v2275_v60  ;;  %v2470_v9 = vrot.slane %v2461_v5, 2  ;;  %v4172_v10 = vpop.f32.mrb[39].mxu0  ;;  %v4188_v11 = vpop.f32.mrb[39].mxu1  ;;  %v4493_v54 = vld [vmem:[%s5455_s7 + $0x30] sm:$0xff]   ;;  %v4494_v57 = vld [vmem:[%s5455_s7 + $0x38] sm:$0xff]   ;;  %v4500_v63 = vld [vmem:[%s5457_s9 + $0x28] sm:$0xff]  }
 0x2ad   : > { %v4497_v60 = vld [vmem:[%s5457_s9 + $0x10] sm:$0xff]  }
 0x2ae   : > { %v2468_v12 = vadd.f32 %v2466_v3, %v2370_v8  ;;  %v2472_v13 = vadd.f32 %v2470_v9, %v2374_v6  ;;  %v2473_v14 = vadd.f32 %v2470_v9, %v2375_v7 }
 0x2b0   : > { %v2474_v15 = vmax.f32 %v1988_v35, %v2468_v12  ;;  %v2475_v16 = vmax.f32 %v1992_v39, %v2472_v13  ;;  %v2476_v17 = vmax.f32 %v1993_v40, %v2473_v14  ;;  %v4478_v35 = vld [vmem:[%s5453_s5 + $0x68] sm:$0xff]  }
 0x2b2   : > { %v2479_v18 = vrot.slane %v2475_v16, 7  ;;  %v2480_v19 = vrot.slane %v2476_v17, 7 }
 0x2b4   : > { %v2481_v20 = vsel %vm1693_vm6, %v2479_v18, %v2480_v19 }
 0x2b5   : > { %v2483_v22 = vmax.f32 %v2474_v15, %v2481_v20 }
 0x2b7   : > { %v2491_v23 = vadd.f32 %v3580_v21, %v2483_v22  ;;  %v2928_v21 = vld [vmem:[%s5454_s6] sm:$0x1] }
 0x2b9   : > { %v2492_v24 = vmax.f32 %v2491_v23, 0.0 }
 0x2bb   : > { %2494 = vst.msk [vmem:[#allocation3] sm:$0x1f] %vm2493_vm7, %v2492_v24 }
 0x2c2   : > { %v2507_v26 = vld [vmem:[#allocation3 + $0x1] sm:$0x1]  ;;  %v2495_v27 = vld [vmem:[#allocation3] sm:$0x1]  ;;  %v2667_v39 = vld [vmem:[#allocation3 + $0x2] sm:$0x1] }
 0x2c3   : > { %v2508_v29 = vpack.c.bf16 %v2507_v26, %v2507_v26  ;;  %v2496_v30 = vpack.c.bf16 %v2495_v27, %v2495_v27  ;;  %v2754_v40 = vld [vmem:[#allocation3 + $0x3] sm:$0x1]  ;;  %v2668_v42 = vpack.c.bf16 %v2667_v39, %v2667_v39  ;;  %v2841_v48 = vld [vmem:[#allocation3 + $0x4] sm:$0x1] }
 0x2c4   : > { %v2755_v43 = vpack.c.bf16 %v2754_v40, %v2754_v40  ;;  %v2842_v49 = vpack.c.bf16 %v2841_v48, %v2841_v48 }
 0x2c5   : > { %4200 = vmatmul.mubr.msk.bf16.vlgmr.msra.gmra.mrb[40].mxu0 %vm2550_vm8, %v2508_v29  ;;  %4214 = vmatmul.mubr.msk.bf16.vlgmr.msra.gmra.mrb[40].mxu1 %vm2550_vm8, %v2496_v30  ;;  %v4501_v29 = vld [vmem:[%s5457_s9 + $0x30] sm:$0xff]   ;;  %v4502_v30 = vld [vmem:[%s5457_s9 + $0x38] sm:$0xff]  }
 0x2c6   : > { %4218 = vmatpush3.bf16.msra.mxu0 %v4472_v25  ;;  %4232 = vmatpush3.bf16.msra.mxu1 %v4473_v28 }
 0x2c7   : > { %4219 = vmatprep.subr.bf16.mxu0 %v4567_v0  ;;  %4233 = vmatprep.subr.bf16.mxu1 %v4567_v0 }
 0x2c8   : > { %4227 = vmatprep.mubr.msk.bf16.mxu0 %vm4568_vm3, %v4567_v0  ;;  %4241 = vmatprep.mubr.msk.bf16.mxu1 %vm4568_vm3, %v4567_v0 }
 0x2ca   : > { %4220 = vmatpush3.bf16.msra.mxu0 %v4474_v31  ;;  %4234 = vmatpush3.bf16.msra.mxu1 %v4475_v32  ;;  %v2948_v31 = vld [vmem:[%s5456_s8] sm:$0x1] }
 0x2cb   : > { %4221 = vmatprep.subr.bf16.mxu0 %v4567_v0  ;;  %4235 = vmatprep.subr.bf16.mxu1 %v4567_v0 }
 0x2ce   : > { %4222 = vmatpush3.bf16.msra.mxu0 %v4476_v33  ;;  %4236 = vmatpush3.bf16.msra.mxu1 %v4477_v34 }
 0x2cf   : > { %4223 = vmatprep.subr.bf16.mxu0 %v4567_v0  ;;  %4237 = vmatprep.subr.bf16.mxu1 %v4567_v0 }
 0x2d2   : > { %4224 = vmatpush3.bf16.msra.mxu0 %v4478_v35  ;;  %4238 = vmatpush3.bf16.msra.mxu1 %v4479_v36 }
 0x2d3   : > { %4225 = vmatprep.subr.bf16.mxu0 %v4567_v0  ;;  %4239 = vmatprep.subr.bf16.mxu1 %v4567_v0 }
 0x2d6   : > { %4226 = vmatpush3.bf16.msra.mxu0 %v4480_v37  ;;  %4240 = vmatpush3.bf16.msra.mxu1 %v4481_v38 }
 0x2d7   : > { %4245 = vmatprep.subr.bf16.mxu0 %v4567_v0  ;;  %4259 = vmatprep.subr.bf16.mxu1 %v4567_v0 }
 0x2d9   : > { %4228 = vmatmul.mubr.msk.bf16.vlgmr.msra.gmra.mrb[44].mxu0 %vm2550_vm8, %v2668_v42  ;;  %4242 = vmatmul.mubr.msk.bf16.vlgmr.msra.gmra.mrb[44].mxu1 %vm2550_vm8, %v2755_v43 }
 0x2da   : > { %4246 = vmatpush3.bf16.msra.mxu0 %v4482_v41  ;;  %4255 = vmatprep.mubr.msk.bf16.mxu0 %vm4568_vm3, %v4567_v0 }
 0x2db   : > { %4247 = vmatprep.subr.bf16.mxu0 %v4567_v0  ;;  %4275 = vmatprep.mubr.msk.bf16.mxu1 %vm4568_vm3, %v4567_v0 }
 0x2dc   : > { %4260 = vmatpush3.bf16.msra.mxu1 %v4487_v50 }
 0x2dd   : > { %4261 = vmatprep.subr.bf16.mxu1 %v4567_v0 }
 0x2de   : > { %4248 = vmatpush3.bf16.msra.mxu0 %v4483_v44 }
 0x2df   : > { %4249 = vmatprep.subr.bf16.mxu0 %v4567_v0 }
 0x2e0   : > { %4262 = vmatpush3.bf16.msra.mxu1 %v4488_v51 }
 0x2e1   : > { %4263 = vmatprep.subr.bf16.mxu1 %v4567_v0 }
 0x2e2   : > { %4250 = vmatpush3.bf16.msra.mxu0 %v4484_v45 }
 0x2e3   : > { %4251 = vmatprep.subr.bf16.mxu0 %v4567_v0 }
 0x2e4   : > { %4264 = vmatpush3.bf16.msra.mxu1 %v4489_v52 }
 0x2e5   : > { %4265 = vmatprep.subr.bf16.mxu1 %v4567_v0 }
 0x2e6   : > { %4252 = vmatpush3.bf16.msra.mxu0 %v4485_v46 }
 0x2e7   : > { %4253 = vmatprep.subr.bf16.mxu0 %v4567_v0 }
 0x2e8   : > { %4266 = vmatpush3.bf16.msra.mxu1 %v4490_v53 }
 0x2e9   : > { %4267 = vmatprep.subr.bf16.mxu1 %v4567_v0 }
 0x2ea   : > { %4254 = vmatpush3.bf16.msra.mxu0 %v4486_v47 }
 0x2eb   : > { %4279 = vmatprep.subr.bf16.mxu0 %v4567_v0 }
 0x2ec   : > { %4268 = vmatpush3.bf16.msra.mxu1 %v4491_v55 }
 0x2ed   : > { %4256 = vmatmul.mubr.msk.bf16.vlgmr.msra.gmra.mrb[48].mxu0 %vm2550_vm8, %v2842_v49  ;;  %4269 = vmatprep.subr.bf16.mxu1 %v4567_v0 }
 0x2ee   : > { %4295 = vmatprep.mubr.msk.bf16.mxu0 %vm4568_vm3, %v4567_v0  ;;  %4280 = vmatpush3.bf16.msra.mxu0 %v4495_v58 }
 0x2ef   : > { %4281 = vmatprep.subr.bf16.mxu0 %v4567_v0 }
 0x2f0   : > { %4270 = vmatpush3.bf16.msra.mxu1 %v4492_v56 }
 0x2f1   : > { %4271 = vmatprep.subr.bf16.mxu1 %v4567_v0 }
 0x2f2   : > { %4282 = vmatpush3.bf16.msra.mxu0 %v4496_v59 }
 0x2f3   : > { %4283 = vmatprep.subr.bf16.mxu0 %v4567_v0 }
 0x2f4   : > { %4272 = vmatpush3.bf16.msra.mxu1 %v4493_v54 }
 0x2f5   : > { %4273 = vmatprep.subr.bf16.mxu1 %v4567_v0 }
 0x2f6   : > { %4284 = vmatpush3.bf16.msra.mxu0 %v4497_v60 }
 0x2f7   : > { %4285 = vmatprep.subr.bf16.mxu0 %v4567_v0 }
 0x2f8   : > { %4274 = vmatpush3.bf16.msra.mxu1 %v4494_v57 }
 0x2fa   : > { %4286 = vmatpush3.bf16.msra.mxu0 %v4498_v61 }
 0x2fb   : > { %4287 = vmatprep.subr.bf16.mxu0 %v4567_v0 }
 0x2fe   : > { %4288 = vmatpush3.bf16.msra.mxu0 %v4499_v62 }
 0x2ff   : > { %4289 = vmatprep.subr.bf16.mxu0 %v4567_v0 }
 0x302   : > { %4290 = vmatpush3.bf16.msra.mxu0 %v4500_v63 }
 0x303   : > { %4291 = vmatprep.subr.bf16.mxu0 %v4567_v0 }
 0x306   : > { %4292 = vmatpush3.bf16.msra.mxu0 %v4501_v29 }
 0x307   : > { %4293 = vmatprep.subr.bf16.mxu0 %v4567_v0  ;;  %v3055_v0 = vld [vmem:[%s5458_s10] sm:$0x1] }
 0x30a   : > { %4294 = vmatpush3.bf16.msra.mxu0 %v4502_v30 }
 0x398   : > { %v2588_v1 = vpop.f32.mrb[40].mxu0  ;;  %v2661_v2 = vpop.f32.mrb[40].mxu1 }
 0x399   : > { %v2662_v3 = vadd.f32 %v2661_v2, %v2588_v1  ;;  %v4201_v4 = vpop.f32.mrb[41].mxu0  ;;  %v4215_v5 = vpop.f32.mrb[41].mxu1 }
 0x39a   : > { %v2591_v6 = vpop.f32.mrb[42].mxu0  ;;  %v2664_v7 = vpop.f32.mrb[42].mxu1 }
 0x39b   : > { %v4202_v8 = vpop.f32.mrb[43].mxu0  ;;  %v4216_v9 = vpop.f32.mrb[43].mxu1 }
 0x3ac   : > { %v2747_v10 = vpop.f32.mrb[44].mxu0  ;;  %v2834_v11 = vpop.f32.mrb[44].mxu1 }
 0x3ad   : > { %v2753_v12 = vadd.f32 %v2747_v10, %v2662_v3  ;;  %v4229_v13 = vpop.f32.mrb[45].mxu0  ;;  %v4243_v14 = vpop.f32.mrb[45].mxu1 }
 0x3ae   : > { %v2750_v15 = vpop.f32.mrb[46].mxu0  ;;  %v2837_v16 = vpop.f32.mrb[46].mxu1 }
 0x3af   : > { %v2840_v17 = vadd.f32 %v2834_v11, %v2753_v12  ;;  %v4230_v18 = vpop.f32.mrb[47].mxu0  ;;  %v4244_v19 = vpop.f32.mrb[47].mxu1 }
 0x3c0   : > { %v2921_v20 = vpop.f32.mrb[48].mxu0 }
 0x3c1   : > { %v2927_v22 = vadd.f32 %v2921_v20, %v2840_v17  ;;  %v4257_v23 = vpop.f32.mrb[49].mxu0 }
 0x3c2   : > { %v2924_v24 = vpop.f32.mrb[50].mxu0 }
 0x3c3   : > { %v2929_v25 = vadd.f32 %v2928_v21, %v2927_v22  ;;  %v4258_v26 = vpop.f32.mrb[51].mxu0 }
 0x3c5   : > { %v2930_v27 = vmax.f32 %v2929_v25, 0.0 }
 0x3c7   : > { %v2931_v28 = vpack.c.bf16 %v2930_v27, %v2930_v27 }
 0x3c9   : > { %4276 = vmatmul.mubr.bf16.vlgmr.msra.gmra.mrb[48].mxu1 %v2931_v28 }
 0x49c   : > { %v3031_v32 = vpop.f32.mrb[48].mxu1 }
 0x49d   : > { %v3032_v33 = vadd.f32 %v3031_v32, %v2948_v31  ;;  %v4277_v34 = vpop.f32.mrb[49].mxu1 }
 0x49e   : > { %v3034_v35 = vpop.f32.mrb[50].mxu1 }
 0x49f   : > { %v3037_v36 = vmax.f32 %v3032_v33, 0.0  ;;  %v4278_v37 = vpop.f32.mrb[51].mxu1 }
 0x4a1   : > { %v3038_v38 = vpack.c.bf16 %v3037_v36, %v3037_v36 }
 0x4a3   : > { %4296 = vmatmul.mubr.bf16.vlgmr.msra.gmra.mrb[52].mxu0 %v3038_v38 }
 0x576   : > { %v3138_v39 = vpop.f32.mrb[52].mxu0 }
 0x577   : > { %v3139_v40 = vadd.f32 %v3138_v39, %v3055_v0  ;;  %v4297_v41 = vpop.f32.mrb[53].mxu0 }
 0x578   : > { %v3141_v42 = vpop.f32.mrb[54].mxu0 }
 0x579   : > { %3144 = vst [vmem:[%s378_s30] sm:$0x1] %v3139_v40  ;;  %v4298_v43 = vpop.f32.mrb[55].mxu0 }
 0x57a   : > { %4516 = shalt.err (!%p4513_p3)
}
 0x57b   : > { %s4517_s22 = scalar_lea.hbm %s5406_s13, 16  ;;  %s4521_s16 = scalar_lea.hbm %s5459_s11, 32 }
 0x57c   : > { %p4518_p4 = scmp.ne.s32.totalorder %s5406_s13, %s4517_s22  ;;  %p4522_p9 = scmp.lt.u32.totalorder %s5406_s13, %s5459_s11 }
 0x57d   : > { %p4523_p10 = scmp.lt.u32.totalorder %s4521_s16, %s4517_s22  ;;  %p4525_p12 = scmp.lt.u32.totalorder %s4517_s22, %s5406_s13 }
 0x57e   : > { %p4519_p7 = pnand %p4518_p4, %p4668_p5 }
 0x57f   : > { %p4524_p11 = por %p4523_p10, %p4522_p9 }
 0x580   : > { %p4520_p8 = pneg %p4519_p7 }
 0x581   : > { %p4526_p13 = por %p4525_p12, %p4524_p11 }
 0x583   : > { %p4527_p0 = pnand %p4526_p13, %p4520_p8 }
 0x585   : > { %4530 = shalt.err (!%p4527_p0)
}
 0x586   : > { %4299 = dma.vmem_to_hbm [thread:$0]  (%p4668_p5), %s5408_s12, 16, %s5406_s13, %s3146_s15  }
 0x587 PF: > { %p4305_p1 = scmp.ge.s32.totalorder %s4565_s20, 2  ;;  %s3170_s21 = sand.u32 1, %s4553_s17  }
 0x588   : > { %s3171_s24 = scalar_lea.sflag [#allocation5], %s3170_s21 }
 0x589   : > { %p4302_p2 = pnand %p4305_p1, %p4672_p6 }
 0x58b   : > { %4548 = dma.done.wait (!%p4302_p2), %s3171_s24, 16  }
 0x58c   : > { %4550 = vsyncadd (!%p4302_p2), %s3171_s24, 4294967280  ;;  %s5463_s25 = sld [smem:[#allocation7_spill]]  ;;  %p21_p3 = scmp.ge.s32.totalorder %s4655_s23, 4  }
 0x58d   : > { %s5464_s17 = smov %s4557_s18  ;;  %s5465_s18 = smov %s4561_s19 }
 0x58e   : > { %s5467_s20 = smov %s4655_s23  ;;  %23 = sbr.rel (!%p21_p3) target bundleno = 3 (0x3), region = 121 }
 0x592   : > { %s5466_s19 = smov %s5463_s25 }
 0x595   :  { %3175 = vsyncpa [#allocation5], 1 }
 0x596   :  { %3177 = vsyncpa [#allocation5 + $0x1], 1 }

</bundles_post_ra>
